<compile_context>
chip_gen: v7x
topology: tpu7x:2x2x1
jax: 0.10.0
libtpu: 0.0.40
codegen_flags: <defaults>
</compile_context>

<pallas_src>
import functools

import jax
import jax.numpy as jnp
from jax import lax
from jax.experimental import pallas as pl
from jax.experimental.pallas import tpu as pltpu

LANE = 128  # TPU lane width; channel dims are padded to this.


def _round_up(x, m):
    return ((x + m - 1) // m) * m


def _vmem_limit_bytes():
    """~75% of physical VMEM (96 MiB on v5e/v6e, 48 MiB on v7x), >= 32 MiB."""
    cap = 64 * 1024 * 1024
    try:
        cap = int(pltpu.get_tpu_info().vmem_capacity_bytes)
    except Exception:
        pass
    return max(32 * 1024 * 1024, min(cap * 3 // 4, 100 * 1024 * 1024))


def _pick_tile(n, candidates):
    for c in candidates:
        if n % c == 0:
            return c
    return n


def _choose_tiles(n_pad, hp, a_resident, vmem_limit, force_stream):
    """Largest (tm, tk) dividing n_pad that keep the working set in budget."""
    if force_stream:
        return 128, 128
    budget = int(vmem_limit * 0.7)
    fixed = 2 * n_pad * hp * 2                       # bf16 ping-pong features
    if a_resident:
        fixed += 2 * n_pad * n_pad * 2               # resident bf16 A (x2 bufs)
    fixed += 4 * (hp * hp * 2 * 2 + 4 * hp * 4 * 2)  # per-layer weight buffers
    for tm in (512, 256, 128):
        if n_pad % tm:
            continue
        for tk in (2048, 1024, 512, 256, 128):
            if n_pad % tk:
                continue
            use = fixed + tm * hp * 4                # f32 K accumulator
            use += 2 * tm * hp * 4                   # output double buffer
            if not a_resident:
                use += 3 * tm * tk * 2               # Buffered(3) A tiles
            if use <= budget:
                return tm, tk
    return 128, 128


def _streamed_a_spec(tm, tk):
    idx = lambda l, i, k: (i, k)
    if hasattr(pl, "Buffered"):
        try:
            return pl.BlockSpec((tm, tk), idx, pipeline_mode=pl.Buffered(3))
        except TypeError:
            pass
    return pl.BlockSpec((tm, tk), idx)


# ----------------------------- Pallas kernels ------------------------------


def fused_gin_kernel(x0_hbm, a_ref, w1_ref, b1_ref, w2_ref, b2_ref,
                     gamma_ref, beta_ref, o_ref,
                     acc_ref, xpp_ref, copy_sem,
                     *, true_h, tm, tk, n_pad, a_resident):
    """All GINConv layers fused into one pallas_call.

    grid = (layer l, row-tile i, k-tile k); k is the reduction over src nodes.
      x0_hbm  : (Np, Hp)         bf16 initial features, raw HBM ref (pl.ANY)
      a_ref   : (Np, Np) or (tm, tk)  bf16 adjacency (resident or streamed)
      w*_ref  : (1, Hp, Hp) bf16 / (1, 1, Hp) f32  per-layer MLP / LN params
      o_ref   : (tm, Hp)         f32 layer-l slice of the jk-concat output
      acc_ref : (tm, Hp)         f32 K-reduction accumulator (scratch)
      xpp_ref : (2*Np, Hp)       bf16 ping-pong feature buffer (scratch)
    """
    l = pl.program_id(0)
    i = pl.program_id(1)
    k = pl.program_id(2)
    nk = pl.num_programs(2)

    # Load the (padded) input features into ping-pong half 0, exactly once.
    @pl.when((l == 0) & (i == 0) & (k == 0))
    def _():
        cp = pltpu.make_async_copy(x0_hbm, xpp_ref.at[pl.ds(0, n_pad)],
                                   copy_sem.at[0])
        cp.start()
        cp.wait()

    @pl.when(k == 0)
    def _():
        acc_ref[...] = jnp.zeros_like(acc_ref)

    # Aggregation: acc += A[i, k] @ x[k]; bf16 operands on the MXU, f32 acc.
    # n_pad is a multiple of both tm and tk, so the ping-pong offsets keep the
    # tk/tm alignment hints valid.
    k_start = pl.multiple_of((l % 2) * n_pad + k * tk, tk)
    x_k = xpp_ref[pl.ds(k_start, tk), :]
    if a_resident:
        i_off = pl.multiple_of(i * tm, tm)
        k_off = pl.multiple_of(k * tk, tk)
        a_tile = a_ref[pl.ds(i_off, tm), pl.ds(k_off, tk)]
    else:
        a_tile = a_ref[...]
    acc_ref[...] += jnp.dot(a_tile, x_k, preferred_element_type=jnp.float32)

    # Epilogue once per (layer, row-tile): skip term + bf16 MLP + masked LN.
    @pl.when(k == nk - 1)
    def _():
        skip_start = pl.multiple_of((l % 2) * n_pad + i * tm, tm)
        x_i = xpp_ref[pl.ds(skip_start, tm), :].astype(jnp.float32)
        h = acc_ref[...] + x_i                        # (1 + eps) * x_i, eps = 0
        h = jnp.dot(h.astype(jnp.bfloat16), w1_ref[0],
                    preferred_element_type=jnp.float32) + b1_ref[0]
        h = jnp.maximum(h, 0.0)
        h = jnp.dot(h.astype(jnp.bfloat16), w2_ref[0],
                    preferred_element_type=jnp.float32) + b2_ref[0]
        h = jnp.maximum(h, 0.0)
        # LayerNorm over the TRUE channels only (lanes >= true_h are padding).
        lane_idx = lax.broadcasted_iota(jnp.int32, h.shape, 1)
        mask = (lane_idx < true_h).astype(jnp.float32)
        inv_h = 1.0 / float(true_h)
        mu = jnp.sum(h * mask, axis=-1, keepdims=True) * inv_h
        d = (h - mu) * mask
        var = jnp.sum(d * d, axis=-1, keepdims=True) * inv_h
        out = (d * lax.rsqrt(var + 1e-5) * gamma_ref[0] + beta_ref[0]) * mask
        o_ref[...] = out
        store_start = pl.multiple_of(((l + 1) % 2) * n_pad + i * tm, tm)
        xpp_ref[pl.ds(store_start, tm), :] = out.astype(jnp.bfloat16)


def readout_kernel(pool_ref, x_ref, w1_ref, b1_ref, w2_ref, b2_ref, o_ref,
                   pooled_ref):
    """global_mean_pool (tiled over nodes) + Lin1 + ReLU + Lin2."""
    k = pl.program_id(0)

    @pl.when(k == 0)
    def _():
        pooled_ref[...] = jnp.zeros_like(pooled_ref)

    pooled_ref[...] += jnp.dot(pool_ref[...], x_ref[...],
                               preferred_element_type=jnp.float32)

    @pl.when(k == pl.num_programs(0) - 1)
    def _():
        h = jnp.dot(pooled_ref[...].astype(jnp.bfloat16), w1_ref[...],
                    preferred_element_type=jnp.float32) + b1_ref[...]
        h = jnp.maximum(h, 0.0)
        # dropout: eval mode (training=False) -> identity
        # 128-lane output (only lane 0 is the real logit) -> lane-dense store.
        o_ref[...] = jnp.dot(h.astype(jnp.bfloat16), w2_ref[...],
                             preferred_element_type=jnp.float32) + b2_ref[...]


# ----------------------------- kernel wrappers ------------------------------


def gin_conv_stack(adj, x0_bf16, pp, true_h, *, force_stream=False):
    """Run all GINConv layers in one fused, tiled pallas_call -> (Np, L*Hp)."""
    n_pad, hp = x0_bf16.shape
    num_layers = pp["w1"].shape[0]
    vmem_limit = _vmem_limit_bytes()

    # Adjacency residency: worth it whenever the (double-buffered) bf16 A plus
    # the bf16 ping-pong features fit well inside the scoped VMEM budget.
    a_bytes = 2 * n_pad * n_pad * 2 + 2 * n_pad * hp * 2
    a_resident = (not force_stream) and (a_bytes <= vmem_limit // 2)

    tm, tk = _choose_tiles(n_pad, hp, a_resident, vmem_limit, force_stream)
    ni, nk = n_pad // tm, n_pad // tk

    if a_resident:
        a_spec = pl.BlockSpec((n_pad, n_pad), lambda l, i, k: (0, 0))
    else:
        a_spec = _streamed_a_spec(tm, tk)

    kernel = functools.partial(fused_gin_kernel, true_h=true_h, tm=tm, tk=tk,
                               n_pad=n_pad, a_resident=a_resident)

    return pl.pallas_call(
        kernel,
        out_shape=jax.ShapeDtypeStruct((n_pad, num_layers * hp), jnp.float32),
        grid_spec=pltpu.PrefetchScalarGridSpec(
            num_scalar_prefetch=0,
            grid=(num_layers, ni, nk),
            in_specs=[
                pl.BlockSpec(memory_space=pl.ANY),                    # x0 (HBM)
                a_spec,                                               # A
                pl.BlockSpec((1, hp, hp), lambda l, i, k: (l, 0, 0)),  # W1 bf16
                pl.BlockSpec((1, 1, hp), lambda l, i, k: (l, 0, 0)),   # b1
                pl.BlockSpec((1, hp, hp), lambda l, i, k: (l, 0, 0)),  # W2 bf16
                pl.BlockSpec((1, 1, hp), lambda l, i, k: (l, 0, 0)),   # b2
                pl.BlockSpec((1, 1, hp), lambda l, i, k: (l, 0, 0)),   # gamma
                pl.BlockSpec((1, 1, hp), lambda l, i, k: (l, 0, 0)),   # beta
            ],
            out_specs=pl.BlockSpec((tm, hp), lambda l, i, k: (i, l)),
            scratch_shapes=[
                pltpu.VMEM((tm, hp), jnp.float32),            # K-reduction acc
                pltpu.VMEM((2 * n_pad, hp), jnp.bfloat16),    # ping-pong x
                pltpu.SemaphoreType.DMA((1,)),                # x0 copy sem
            ],
        ),
        compiler_params=pltpu.CompilerParams(
            # x is carried in per-core VMEM scratch across layer / row axes,
            # so every grid axis must stay sequential ("arbitrary").
            dimension_semantics=("arbitrary", "arbitrary", "arbitrary"),
            vmem_limit_bytes=vmem_limit,
        ),
    )(x0_bf16, adj, pp["w1"], pp["b1"], pp["w2"], pp["b2"],
      pp["gamma"], pp["beta"])


def readout(pool, xcat, pp):
    g_pad, n_pad = pool.shape
    lhp = xcat.shape[1]
    outp = pp["lin2_w"].shape[1]
    tkn = _pick_tile(n_pad, (1024, 512, 256, 128))
    nk = n_pad // tkn
    return pl.pallas_call(
        readout_kernel,
        out_shape=jax.ShapeDtypeStruct((g_pad, outp), jnp.float32),
        grid_spec=pltpu.PrefetchScalarGridSpec(
            num_scalar_prefetch=0,
            grid=(nk,),
            in_specs=[
                pl.BlockSpec((g_pad, tkn), lambda k: (0, k)),     # pool tile
                pl.BlockSpec((tkn, lhp), lambda k: (k, 0)),       # xcat tile
                pl.BlockSpec(pp["lin1_w"].shape, lambda k: (0, 0)),
                pl.BlockSpec(pp["lin1_b"].shape, lambda k: (0, 0)),
                pl.BlockSpec(pp["lin2_w"].shape, lambda k: (0, 0)),
                pl.BlockSpec(pp["lin2_b"].shape, lambda k: (0, 0)),
            ],
            out_specs=pl.BlockSpec((g_pad, outp), lambda k: (0, 0)),
            scratch_shapes=[pltpu.VMEM((g_pad, lhp), jnp.float32)],
        ),
        compiler_params=pltpu.CompilerParams(
            dimension_semantics=("arbitrary",),
            vmem_limit_bytes=_vmem_limit_bytes(),
        ),
    )(pool, xcat, pp["lin1_w"], pp["lin1_b"], pp["lin2_w"], pp["lin2_b"])


# ------------------------------- model glue --------------------------------


def init_params(key, hidden_channels, num_layers, max_z):
    """True-(unpadded-)shape f32 parameters, matching the torch module layout."""
    keys = jax.random.split(key, 2 + 4 * num_layers)
    ki = iter(keys)

    def lin(k, fan_in, fan_out):
        bound = 1.0 / jnp.sqrt(jnp.float32(fan_in))
        kw, kb = jax.random.split(k)
        w = jax.random.uniform(kw, (fan_in, fan_out), jnp.float32, -bound, bound)
        b = jax.random.uniform(kb, (1, fan_out), jnp.float32, -bound, bound)
        return w, b

    params = {
        "z_emb": jax.random.normal(next(ki), (max_z, hidden_channels), jnp.float32),
        "layers": [],
    }
    for _ in range(num_layers):
        cin = hidden_channels  # use_feature=False, node_embedding=None
        w1, b1 = lin(next(ki), cin, hidden_channels)
        w2, b2 = lin(next(ki), hidden_channels, hidden_channels)
        params["layers"].append({
            "w1": w1, "b1": b1, "w2": w2, "b2": b2,
            "gamma": jnp.ones((1, hidden_channels), jnp.float32),
            "beta": jnp.zeros((1, hidden_channels), jnp.float32),
        })
    lw1, lb1 = lin(next(ki), num_layers * hidden_channels, hidden_channels)
    lw2, lb2 = lin(next(ki), hidden_channels, 1)
    params["lin1_w"], params["lin1_b"] = lw1, lb1
    params["lin2_w"], params["lin2_b"] = lw2, lb2
    return params


def _pad2(x, rows, cols):
    return jnp.zeros((rows, cols), jnp.float32).at[: x.shape[0], : x.shape[1]].set(x)


def pad_params(params, hp, outp):
    """Pad channel dims to the lane width; MXU weights stored in bf16."""
    layers = params["layers"]
    num_layers = len(layers)
    h = layers[0]["w1"].shape[1]

    p = {
        "z_emb": _pad2(params["z_emb"], params["z_emb"].shape[0], hp),
        "w1": jnp.stack([_pad2(lp["w1"], hp, hp) for lp in layers]).astype(jnp.bfloat16),
        "b1": jnp.stack([_pad2(lp["b1"], 1, hp) for lp in layers]),
        "w2": jnp.stack([_pad2(lp["w2"], hp, hp) for lp in layers]).astype(jnp.bfloat16),
        "b2": jnp.stack([_pad2(lp["b2"], 1, hp) for lp in layers]),
        "gamma": jnp.stack([_pad2(lp["gamma"], 1, hp) for lp in layers]),
        "beta": jnp.stack([_pad2(lp["beta"], 1, hp) for lp in layers]),
    }
    # lin1 rows follow the padded concat layout: layer l occupies rows l*hp..+h
    lin1_w = jnp.zeros((num_layers * hp, hp), jnp.float32)
    for l in range(num_layers):
        lin1_w = lin1_w.at[l * hp: l * hp + h, :h].set(
            params["lin1_w"][l * h: (l + 1) * h, :])
    p["lin1_w"] = lin1_w.astype(jnp.bfloat16)
    p["lin1_b"] = _pad2(params["lin1_b"], 1, hp)
    p["lin2_w"] = _pad2(params["lin2_w"], hp, outp).astype(jnp.bfloat16)
    p["lin2_b"] = _pad2(params["lin2_b"], 1, outp)
    return p


@functools.partial(jax.jit,
                   static_argnames=("num_graphs", "hidden_channels", "force_stream"))
def gin_forward(pp, z, edge_index, batch, num_graphs, hidden_channels,
                force_stream=False):
    n = z.shape[0]
    n_pad = _round_up(max(n, 8), LANE)

    # z embedding lookup (glue); z is 1-D so no .sum(dim=1) branch is taken.
    x0 = pp["z_emb"][z]
    x0 = jnp.pad(x0, ((0, n_pad - n), (0, 0))).astype(jnp.bfloat16)

    # Dense adjacency built DIRECTLY in bf16: A[dst, src] = multiplicity
    # (messages flow src -> dst); exact for integer edge counts < 256.
    src, dst = edge_index[0], edge_index[1]
    adj = jnp.zeros((n_pad, n_pad), jnp.bfloat16).at[dst, src].add(jnp.bfloat16(1.0))

    # Fused GINConv stack; output is the jk-concat of all layers (pad lanes 0).
    xcat = gin_conv_stack(adj, x0, pp, hidden_channels, force_stream=force_stream)

    # global mean pool as a (G, Np) matrix: row g = 1/count_g on nodes of g.
    g_pad = _round_up(num_graphs, 8)
    one_hot = (batch[None, :] == jnp.arange(num_graphs)[:, None]).astype(jnp.float32)
    counts = jnp.maximum(one_hot.sum(axis=1, keepdims=True), 1.0)
    pool = jnp.pad(one_hot / counts,
                   ((0, g_pad - num_graphs), (0, n_pad - n)))

    out = readout(pool, xcat, pp)          # (g_pad, 128), lane 0 is the logit
    return out[:num_graphs, :1]


def gin_forward_ref(params, z, edge_index, batch, num_graphs):
    """Pure-JAX, unpadded f32 reference of the torch forward (verification)."""
    n = z.shape[0]
    x = params["z_emb"][z]
    src, dst = edge_index[0], edge_index[1]
    a = jnp.zeros((n, n), jnp.float32).at[dst, src].add(1.0)
    xs = []
    for lp in params["layers"]:
        h = x + a @ x
        h = jax.nn.relu(h @ lp["w1"] + lp["b1"])
        h = jax.nn.relu(h @ lp["w2"] + lp["b2"])
        mu = h.mean(-1, keepdims=True)
        var = ((h - mu) ** 2).mean(-1, keepdims=True)
        x = (h - mu) / jnp.sqrt(var + 1e-5) * lp["gamma"] + lp["beta"]
        xs.append(x)
    xcat = jnp.concatenate(xs, axis=1)
    one_hot = (batch[None, :] == jnp.arange(num_graphs)[:, None]).astype(jnp.float32)
    pooled = (one_hot @ xcat) / jnp.maximum(one_hot.sum(1, keepdims=True), 1.0)
    h = jax.nn.relu(pooled @ params["lin1_w"] + params["lin1_b"])
    return h @ params["lin2_w"] + params["lin2_b"]


# --------------------------------- driver ----------------------------------

if __name__ == "__main__":
    hidden_channels = 32
    num_layers = 3
    max_z = 10
    num_graphs = 2

    key = jax.random.PRNGKey(0)
    kp, kz, ke = jax.random.split(key, 3)

    params = init_params(kp, hidden_channels, num_layers, max_z)
    padded = pad_params(params, hp=LANE, outp=LANE)

    def make_graph(n_nodes, kz_, ke_, n_edges_per_graph=20):
        z_ = jax.random.randint(kz_, (n_nodes,), 0, max_z, dtype=jnp.int32)
        ke0, ke1 = jax.random.split(ke_)
        half = n_nodes // 2
        src0 = jax.random.randint(ke0, (n_edges_per_graph,), 0, half, jnp.int32)
        dst0 = jax.random.randint(ke1, (n_edges_per_graph,), 0, half, jnp.int32)
        src = jnp.concatenate([src0, src0 + half])
        dst = jnp.concatenate([dst0, dst0 + half])
        ei_ = jnp.stack([src, dst], axis=0)
        batch_ = jnp.concatenate([jnp.zeros((half,), jnp.int32),
                                  jnp.ones((n_nodes - half,), jnp.int32)])
        return z_, ei_, batch_

    # Case 1: small graph -> adjacency resident in VMEM (single-fetch path).
    z, edge_index, batch = make_graph(16, kz, ke, n_edges_per_graph=20)
    out = gin_forward(padded, z, edge_index, batch,
                      num_graphs=num_graphs, hidden_channels=hidden_channels)
    out = jax.block_until_ready(out)
    assert out.shape == (num_graphs, 1) and out.dtype == jnp.float32
    ref = gin_forward_ref(params, z, edge_index, batch, num_graphs)
    assert bool(jnp.allclose(out, ref, rtol=1e-1, atol=1e-1)), (out, ref)

    # Case 2: larger padded graph -> streamed A tiles, multi-(i,k) grid,
    # exercising the ping-pong buffer across row tiles and padded rows.
    kz2, ke2 = jax.random.split(jax.random.PRNGKey(1))
    z2, ei2, batch2 = make_graph(200, kz2, ke2, n_edges_per_graph=200)
    out2 = gin_forward(padded, z2, ei2, batch2,
                       num_graphs=num_graphs, hidden_channels=hidden_channels,
                       force_stream=True)
    out2 = jax.block_until_ready(out2)
    ref2 = gin_forward_ref(params, z2, ei2, batch2, num_graphs)
    assert bool(jnp.allclose(out2, ref2, rtol=1e-1, atol=1e-1)), (out2, ref2)

    print("KERNEL_OK")
</pallas_src>

<mosaic_0001>
module attributes {stable_mosaic.version = 11 : i64} {
  func.func @fused_gin_kernel(%arg0: i32, %arg1: i32, %arg2: i32, %arg3: memref<128x128xbf16, #tpu.memory_space<any>>, %arg4: memref<128x128xbf16, #tpu.memory_space<vmem>>, %arg5: memref<1x128x128xbf16, #tpu.memory_space<vmem>>, %arg6: memref<1x1x128xf32, #tpu.memory_space<vmem>>, %arg7: memref<1x128x128xbf16, #tpu.memory_space<vmem>>, %arg8: memref<1x1x128xf32, #tpu.memory_space<vmem>>, %arg9: memref<1x1x128xf32, #tpu.memory_space<vmem>>, %arg10: memref<1x1x128xf32, #tpu.memory_space<vmem>>, %arg11: memref<128x128xf32, #tpu.memory_space<vmem>>, %arg12: memref<128x128xf32, #tpu.memory_space<vmem>>, %arg13: memref<256x128xbf16, #tpu.memory_space<vmem>>, %arg14: memref<1x!tpu.dma_semaphore, #tpu.memory_space<semaphore_mem>>) attributes {dimension_semantics = [#tpu.dimension_semantics<arbitrary>, #tpu.dimension_semantics<arbitrary>, #tpu.dimension_semantics<arbitrary>], iteration_bounds = array<i64: 3, 1, 1>, scalar_prefetch = 0 : i64, scratch_operands = 3 : i64, tpu.core_type = #tpu.core_type<tc>, window_params = [{}, {pipeline_mode = #tpu.pipeline_mode<synchronous>, transform_indices = @transform_1, window_bounds = array<i64: 128, 128>}, {transform_indices = @transform_2, window_bounds = array<i64: 1, 128, 128>}, {transform_indices = @transform_3, window_bounds = array<i64: 1, 1, 128>}, {transform_indices = @transform_4, window_bounds = array<i64: 1, 128, 128>}, {transform_indices = @transform_5, window_bounds = array<i64: 1, 1, 128>}, {transform_indices = @transform_6, window_bounds = array<i64: 1, 1, 128>}, {transform_indices = @transform_7, window_bounds = array<i64: 1, 1, 128>}, {transform_indices = @transform_8, window_bounds = array<i64: 128, 128>}]} {
    %c0_i32 = arith.constant 0 : i32
    %0 = arith.cmpi eq, %arg0, %c0_i32 : i32
    %c0_i32_0 = arith.constant 0 : i32
    %1 = arith.cmpi eq, %arg1, %c0_i32_0 : i32
    %2 = arith.andi %0, %1 : i1
    %c0_i32_1 = arith.constant 0 : i32
    %3 = arith.cmpi eq, %arg2, %c0_i32_1 : i32
    %4 = arith.andi %2, %3 : i1
    %5 = arith.extui %4 : i1 to i32
    %c0_i32_2 = arith.constant 0 : i32
    %6 = arith.cmpi ne, %5, %c0_i32_2 : i32
    scf.if %6 {
      %c0_i32_18 = arith.constant 0 : i32
      %c0_i32_19 = arith.constant 0 : i32
      %c0_i32_20 = arith.constant 0 : i32
      %40 = tpu.memref_slice %arg13[%c0_i32_19, %c0_i32_20] : memref<256x128xbf16, #tpu.memory_space<vmem>> -> memref<128x128xbf16, #tpu.memory_space<vmem>>
      %41 = tpu.memref_slice %arg14[%c0_i32_18] : memref<1x!tpu.dma_semaphore, #tpu.memory_space<semaphore_mem>> -> memref<1x!tpu.dma_semaphore, #tpu.memory_space<semaphore_mem>>
      %42 = tpu.memref_squeeze %41 : memref<1x!tpu.dma_semaphore, #tpu.memory_space<semaphore_mem>> -> memref<!tpu.dma_semaphore, #tpu.memory_space<semaphore_mem>>
      tpu.enqueue_dma source(%arg3 : memref<128x128xbf16, #tpu.memory_space<any>>) target(%40 : memref<128x128xbf16, #tpu.memory_space<vmem>>) target_semaphore(%42 : memref<!tpu.dma_semaphore, #tpu.memory_space<semaphore_mem>>)
      %c0_i32_21 = arith.constant 0 : i32
      %c0_i32_22 = arith.constant 0 : i32
      %c0_i32_23 = arith.constant 0 : i32
      %43 = tpu.memref_slice %arg13[%c0_i32_22, %c0_i32_23] : memref<256x128xbf16, #tpu.memory_space<vmem>> -> memref<128x128xbf16, #tpu.memory_space<vmem>>
      %44 = tpu.memref_slice %arg14[%c0_i32_21] : memref<1x!tpu.dma_semaphore, #tpu.memory_space<semaphore_mem>> -> memref<1x!tpu.dma_semaphore, #tpu.memory_space<semaphore_mem>>
      %45 = tpu.memref_squeeze %44 : memref<1x!tpu.dma_semaphore, #tpu.memory_space<semaphore_mem>> -> memref<!tpu.dma_semaphore, #tpu.memory_space<semaphore_mem>>
      tpu.wait_dma2 semaphore(%45 : memref<!tpu.dma_semaphore, #tpu.memory_space<semaphore_mem>>) src(%arg3 : memref<128x128xbf16, #tpu.memory_space<any>>) dst(%43 : memref<128x128xbf16, #tpu.memory_space<vmem>>)
    } else {
    }
    %c0_i32_3 = arith.constant 0 : i32
    %7 = arith.cmpi eq, %arg2, %c0_i32_3 : i32
    %8 = arith.extui %7 : i1 to i32
    %c0_i32_4 = arith.constant 0 : i32
    %9 = arith.cmpi ne, %8, %c0_i32_4 : i32
    scf.if %9 {
      %cst_18 = arith.constant 0.000000e+00 : f32
      %40 = vector.broadcast %cst_18 : f32 to vector<128x128xf32>
      %c0_19 = arith.constant 0 : index
      %c0_20 = arith.constant 0 : index
      %41 = vector.load %arg12[%c0_19, %c0_20] : memref<128x128xf32, #tpu.memory_space<vmem>>, vector<128x128xf32>
      tpu.vector_store %arg12[%c0_19, %c0_20], %40 {strides = array<i32>} : memref<128x128xf32, #tpu.memory_space<vmem>>, vector<128x128xf32>,
    } else {
    }
    %c2_i32 = arith.constant 2 : i32
    %c0_i32_5 = arith.constant 0 : i32
    %10 = arith.cmpi eq, %c2_i32, %c0_i32_5 : i32
    %c1_i32 = arith.constant 1 : i32
    %11 = arith.select %10, %c1_i32, %c2_i32 : i32
    %12 = arith.remsi %arg0, %11 : i32
    %c0_i32_6 = arith.constant 0 : i32
    %13 = arith.cmpi ne, %12, %c0_i32_6 : i32
    %c0_i32_7 = arith.constant 0 : i32
    %14 = arith.cmpi slt, %12, %c0_i32_7 : i32
    %c0_i32_8 = arith.constant 0 : i32
    %15 = arith.cmpi slt, %11, %c0_i32_8 : i32
    %16 = arith.xori %14, %15 : i1
    %17 = arith.andi %16, %13 : i1
    %18 = arith.addi %12, %11 : i32
    %19 = arith.select %17, %18, %12 : i32
    %c128_i32 = arith.constant 128 : i32
    %20 = arith.muli %19, %c128_i32 : i32
    %c128_i32_9 = arith.constant 128 : i32
    %21 = arith.muli %arg2, %c128_i32_9 : i32
    %22 = arith.addi %20, %21 : i32
    %23 = tpu.assume_multiple %22, 128 : i32
    %24 = arith.index_cast %23 : i32 to index
    %c0 = arith.constant 0 : index
    %25 = vector.load %arg13[%24, %c0] : memref<256x128xbf16, #tpu.memory_space<vmem>>, vector<128x128xbf16>
    %c128_i32_10 = arith.constant 128 : i32
    %26 = arith.muli %arg1, %c128_i32_10 : i32
    %27 = tpu.assume_multiple %26, 128 : i32
    %c128_i32_11 = arith.constant 128 : i32
    %28 = arith.muli %arg2, %c128_i32_11 : i32
    %29 = tpu.assume_multiple %28, 128 : i32
    %30 = arith.index_cast %27 : i32 to index
    %31 = arith.index_cast %29 : i32 to index
    %32 = vector.load %arg4[%30, %31] : memref<128x128xbf16, #tpu.memory_space<vmem>>, vector<128x128xbf16>
    %c0_12 = arith.constant 0 : index
    %c0_13 = arith.constant 0 : index
    %33 = vector.load %arg12[%c0_12, %c0_13] : memref<128x128xf32, #tpu.memory_space<vmem>>, vector<128x128xf32>
    %cst = arith.constant dense<0.000000e+00> : vector<128x128xf32>
    %34 = tpu.matmul %32, %25, %cst {dimension_numbers = #tpu.dot_dimension_numbers<[1], [0], [0], [1], [0, 0, 1, 1], [], []>} : vector<128x128xbf16>, vector<128x128xbf16>, vector<128x128xf32> -> vector<128x128xf32>
    %35 = arith.addf %33, %34 : vector<128x128xf32>
    %c0_14 = arith.constant 0 : index
    %c0_15 = arith.constant 0 : index
    %36 = vector.load %arg12[%c0_14, %c0_15] : memref<128x128xf32, #tpu.memory_space<vmem>>, vector<128x128xf32>
    tpu.vector_store %arg12[%c0_14, %c0_15], %35 {strides = array<i32>} : memref<128x128xf32, #tpu.memory_space<vmem>>, vector<128x128xf32>,
    %c0_i32_16 = arith.constant 0 : i32
    %37 = arith.cmpi eq, %arg2, %c0_i32_16 : i32
    %38 = arith.extui %37 : i1 to i32
    %c0_i32_17 = arith.constant 0 : i32
    %39 = arith.cmpi ne, %38, %c0_i32_17 : i32
    scf.if %39 {
      %c2_i32_18 = arith.constant 2 : i32
      %c0_i32_19 = arith.constant 0 : i32
      %40 = arith.cmpi eq, %c2_i32_18, %c0_i32_19 : i32
      %c1_i32_20 = arith.constant 1 : i32
      %41 = arith.select %40, %c1_i32_20, %c2_i32_18 : i32
      %42 = arith.remsi %arg0, %41 : i32
      %c0_i32_21 = arith.constant 0 : i32
      %43 = arith.cmpi ne, %42, %c0_i32_21 : i32
      %c0_i32_22 = arith.constant 0 : i32
      %44 = arith.cmpi slt, %42, %c0_i32_22 : i32
      %c0_i32_23 = arith.constant 0 : i32
      %45 = arith.cmpi slt, %41, %c0_i32_23 : i32
      %46 = arith.xori %44, %45 : i1
      %47 = arith.andi %46, %43 : i1
      %48 = arith.addi %42, %41 : i32
      %49 = arith.select %47, %48, %42 : i32
      %c128_i32_24 = arith.constant 128 : i32
      %50 = arith.muli %49, %c128_i32_24 : i32
      %c128_i32_25 = arith.constant 128 : i32
      %51 = arith.muli %arg1, %c128_i32_25 : i32
      %52 = arith.addi %50, %51 : i32
      %53 = tpu.assume_multiple %52, 128 : i32
      %54 = arith.index_cast %53 : i32 to index
      %c0_26 = arith.constant 0 : index
      %55 = vector.load %arg13[%54, %c0_26] : memref<256x128xbf16, #tpu.memory_space<vmem>>, vector<128x128xbf16>
      %56 = arith.extf %55 : vector<128x128xbf16> to vector<128x128xf32>
      %c0_27 = arith.constant 0 : index
      %c0_28 = arith.constant 0 : index
      %57 = vector.load %arg12[%c0_27, %c0_28] : memref<128x128xf32, #tpu.memory_space<vmem>>, vector<128x128xf32>
      %58 = arith.addf %57, %56 : vector<128x128xf32>
      %59 = arith.truncf %58 : vector<128x128xf32> to vector<128x128xbf16>
      %c0_29 = arith.constant 0 : index
      %c0_30 = arith.constant 0 : index
      %c0_31 = arith.constant 0 : index
      %60 = vector.load %arg5[%c0_29, %c0_30, %c0_31] : memref<1x128x128xbf16, #tpu.memory_space<vmem>>, vector<1x128x128xbf16>
      %61 = vector.shape_cast %60 : vector<1x128x128xbf16> to vector<128x128xbf16>
      %cst_32 = arith.constant dense<0.000000e+00> : vector<128x128xf32>
      %62 = tpu.matmul %59, %61, %cst_32 {dimension_numbers = #tpu.dot_dimension_numbers<[1], [0], [0], [1], [0, 0, 1, 1], [], []>} : vector<128x128xbf16>, vector<128x128xbf16>, vector<128x128xf32> -> vector<128x128xf32>
      %c0_33 = arith.constant 0 : index
      %c0_34 = arith.constant 0 : index
      %c0_35 = arith.constant 0 : index
      %63 = vector.load %arg6[%c0_33, %c0_34, %c0_35] : memref<1x1x128xf32, #tpu.memory_space<vmem>>, vector<1x1x128xf32>
      %64 = vector.shape_cast %63 : vector<1x1x128xf32> to vector<1x128xf32>
      %65 = vector.broadcast %64 : vector<1x128xf32> to vector<128x128xf32>
      %66 = arith.addf %62, %65 : vector<128x128xf32>
      %cst_36 = arith.constant 0.000000e+00 : f32
      %67 = vector.broadcast %cst_36 : f32 to vector<128x128xf32>
      %68 = arith.maximumf %66, %67 : vector<128x128xf32>
      %69 = arith.truncf %68 : vector<128x128xf32> to vector<128x128xbf16>
      %c0_37 = arith.constant 0 : index
      %c0_38 = arith.constant 0 : index
      %c0_39 = arith.constant 0 : index
      %70 = vector.load %arg7[%c0_37, %c0_38, %c0_39] : memref<1x128x128xbf16, #tpu.memory_space<vmem>>, vector<1x128x128xbf16>
      %71 = vector.shape_cast %70 : vector<1x128x128xbf16> to vector<128x128xbf16>
      %cst_40 = arith.constant dense<0.000000e+00> : vector<128x128xf32>
      %72 = tpu.matmul %69, %71, %cst_40 {dimension_numbers = #tpu.dot_dimension_numbers<[1], [0], [0], [1], [0, 0, 1, 1], [], []>} : vector<128x128xbf16>, vector<128x128xbf16>, vector<128x128xf32> -> vector<128x128xf32>
      %c0_41 = arith.constant 0 : index
      %c0_42 = arith.constant 0 : index
      %c0_43 = arith.constant 0 : index
      %73 = vector.load %arg8[%c0_41, %c0_42, %c0_43] : memref<1x1x128xf32, #tpu.memory_space<vmem>>, vector<1x1x128xf32>
      %74 = vector.shape_cast %73 : vector<1x1x128xf32> to vector<1x128xf32>
      %75 = vector.broadcast %74 : vector<1x128xf32> to vector<128x128xf32>
      %76 = arith.addf %72, %75 : vector<128x128xf32>
      %cst_44 = arith.constant 0.000000e+00 : f32
      %77 = vector.broadcast %cst_44 : f32 to vector<128x128xf32>
      %78 = arith.maximumf %76, %77 : vector<128x128xf32>
      %79 = tpu.iota {dimensions = array<i32: 1>} : vector<128x128xi32>
      %c32_i32 = arith.constant 32 : i32
      %80 = vector.broadcast %c32_i32 : i32 to vector<128x128xi32>
      %81 = arith.cmpi slt, %79, %80 : vector<128x128xi32>
      %82 = arith.extui %81 : vector<128x128xi1> to vector<128x128xi32>
      %83 = arith.sitofp %82 : vector<128x128xi32> to vector<128x128xf32>
      %84 = arith.mulf %78, %83 : vector<128x128xf32>
      %cst_45 = arith.constant dense<0.000000e+00> : vector<128xf32>
      %85 = vector.multi_reduction <add>, %84, %cst_45 [1] : vector<128x128xf32> to vector<128xf32>
      %86 = vector.shape_cast %85 : vector<128xf32> to vector<128x1xf32>
      %cst_46 = arith.constant 3.125000e-02 : f32
      %87 = vector.broadcast %cst_46 : f32 to vector<128x1xf32>
      %88 = arith.mulf %86, %87 : vector<128x1xf32>
      %89 = vector.broadcast %88 : vector<128x1xf32> to vector<128x128xf32>
      %90 = arith.subf %78, %89 : vector<128x128xf32>
      %91 = arith.mulf %90, %83 : vector<128x128xf32>
      %92 = arith.mulf %91, %91 : vector<128x128xf32>
      %cst_47 = arith.constant dense<0.000000e+00> : vector<128xf32>
      %93 = vector.multi_reduction <add>, %92, %cst_47 [1] : vector<128x128xf32> to vector<128xf32>
      %94 = vector.shape_cast %93 : vector<128xf32> to vector<128x1xf32>
      %cst_48 = arith.constant 3.125000e-02 : f32
      %95 = vector.broadcast %cst_48 : f32 to vector<128x1xf32>
      %96 = arith.mulf %94, %95 : vector<128x1xf32>
      %cst_49 = arith.constant 9.99999974E-6 : f32
      %97 = vector.broadcast %cst_49 : f32 to vector<128x1xf32>
      %98 = arith.addf %96, %97 : vector<128x1xf32>
      %99 = math.rsqrt %98 : vector<128x1xf32>
      %100 = vector.broadcast %99 : vector<128x1xf32> to vector<128x128xf32>
      %101 = arith.mulf %91, %100 : vector<128x128xf32>
      %c0_50 = arith.constant 0 : index
      %c0_51 = arith.constant 0 : index
      %c0_52 = arith.constant 0 : index
      %102 = vector.load %arg9[%c0_50, %c0_51, %c0_52] : memref<1x1x128xf32, #tpu.memory_space<vmem>>, vector<1x1x128xf32>
      %103 = vector.shape_cast %102 : vector<1x1x128xf32> to vector<1x128xf32>
      %104 = vector.broadcast %103 : vector<1x128xf32> to vector<128x128xf32>
      %105 = arith.mulf %101, %104 : vector<128x128xf32>
      %c0_53 = arith.constant 0 : index
      %c0_54 = arith.constant 0 : index
      %c0_55 = arith.constant 0 : index
      %106 = vector.load %arg10[%c0_53, %c0_54, %c0_55] : memref<1x1x128xf32, #tpu.memory_space<vmem>>, vector<1x1x128xf32>
      %107 = vector.shape_cast %106 : vector<1x1x128xf32> to vector<1x128xf32>
      %108 = vector.broadcast %107 : vector<1x128xf32> to vector<128x128xf32>
      %109 = arith.addf %105, %108 : vector<128x128xf32>
      %110 = arith.mulf %109, %83 : vector<128x128xf32>
      %c0_56 = arith.constant 0 : index
      %c0_57 = arith.constant 0 : index
      %111 = vector.load %arg11[%c0_56, %c0_57] : memref<128x128xf32, #tpu.memory_space<vmem>>, vector<128x128xf32>
      tpu.vector_store %arg11[%c0_56, %c0_57], %110 {strides = array<i32>} : memref<128x128xf32, #tpu.memory_space<vmem>>, vector<128x128xf32>,
      %c1_i32_58 = arith.constant 1 : i32
      %112 = arith.addi %arg0, %c1_i32_58 : i32
      %c2_i32_59 = arith.constant 2 : i32
      %c0_i32_60 = arith.constant 0 : i32
      %113 = arith.cmpi eq, %c2_i32_59, %c0_i32_60 : i32
      %c1_i32_61 = arith.constant 1 : i32
      %114 = arith.select %113, %c1_i32_61, %c2_i32_59 : i32
      %115 = arith.remsi %112, %114 : i32
      %c0_i32_62 = arith.constant 0 : i32
      %116 = arith.cmpi ne, %115, %c0_i32_62 : i32
      %c0_i32_63 = arith.constant 0 : i32
      %117 = arith.cmpi slt, %115, %c0_i32_63 : i32
      %c0_i32_64 = arith.constant 0 : i32
      %118 = arith.cmpi slt, %114, %c0_i32_64 : i32
      %119 = arith.xori %117, %118 : i1
      %120 = arith.andi %119, %116 : i1
      %121 = arith.addi %115, %114 : i32
      %122 = arith.select %120, %121, %115 : i32
      %c128_i32_65 = arith.constant 128 : i32
      %123 = arith.muli %122, %c128_i32_65 : i32
      %c128_i32_66 = arith.constant 128 : i32
      %124 = arith.muli %arg1, %c128_i32_66 : i32
      %125 = arith.addi %123, %124 : i32
      %126 = tpu.assume_multiple %125, 128 : i32
      %127 = arith.truncf %110 : vector<128x128xf32> to vector<128x128xbf16>
      %128 = arith.index_cast %126 : i32 to index
      %c0_67 = arith.constant 0 : index
      %129 = vector.load %arg13[%128, %c0_67] : memref<256x128xbf16, #tpu.memory_space<vmem>>, vector<128x128xbf16>
      tpu.vector_store %arg13[%128, %c0_67], %127 {strides = array<i32>} : memref<256x128xbf16, #tpu.memory_space<vmem>>, vector<128x128xbf16>,
    } else {
    }
    return
  }
  func.func @transform_1(%arg0: i32, %arg1: i32, %arg2: i32) -> (i32, i32) {
    %c0_i32 = arith.constant 0 : i32
    %c0_i32_0 = arith.constant 0 : i32
    %c0_i32_1 = arith.constant 0 : i32
    return %c0_i32, %c0_i32_0 : i32, i32
  }
  func.func @transform_2(%arg0: i32, %arg1: i32, %arg2: i32) -> (i32, i32, i32) {
    %c0_i32 = arith.constant 0 : i32
    %c0_i32_0 = arith.constant 0 : i32
    %c0_i32_1 = arith.constant 0 : i32
    return %arg0, %c0_i32, %c0_i32_0 : i32, i32, i32
  }
  func.func @transform_3(%arg0: i32, %arg1: i32, %arg2: i32) -> (i32, i32, i32) {
    %c0_i32 = arith.constant 0 : i32
    %c0_i32_0 = arith.constant 0 : i32
    %c0_i32_1 = arith.constant 0 : i32
    return %arg0, %c0_i32, %c0_i32_0 : i32, i32, i32
  }
  func.func @transform_4(%arg0: i32, %arg1: i32, %arg2: i32) -> (i32, i32, i32) {
    %c0_i32 = arith.constant 0 : i32
    %c0_i32_0 = arith.constant 0 : i32
    %c0_i32_1 = arith.constant 0 : i32
    return %arg0, %c0_i32, %c0_i32_0 : i32, i32, i32
  }
  func.func @transform_5(%arg0: i32, %arg1: i32, %arg2: i32) -> (i32, i32, i32) {
    %c0_i32 = arith.constant 0 : i32
    %c0_i32_0 = arith.constant 0 : i32
    %c0_i32_1 = arith.constant 0 : i32
    return %arg0, %c0_i32, %c0_i32_0 : i32, i32, i32
  }
  func.func @transform_6(%arg0: i32, %arg1: i32, %arg2: i32) -> (i32, i32, i32) {
    %c0_i32 = arith.constant 0 : i32
    %c0_i32_0 = arith.constant 0 : i32
    %c0_i32_1 = arith.constant 0 : i32
    return %arg0, %c0_i32, %c0_i32_0 : i32, i32, i32
  }
  func.func @transform_7(%arg0: i32, %arg1: i32, %arg2: i32) -> (i32, i32, i32) {
    %c0_i32 = arith.constant 0 : i32
    %c0_i32_0 = arith.constant 0 : i32
    %c0_i32_1 = arith.constant 0 : i32
    return %arg0, %c0_i32, %c0_i32_0 : i32, i32, i32
  }
  func.func @transform_8(%arg0: i32, %arg1: i32, %arg2: i32) -> (i32, i32) {
    %c0_i32 = arith.constant 0 : i32
    return %arg1, %arg0 : i32, i32
  }
}

module attributes {stable_mosaic.version = 11 : i64} {
  func.func @readout_kernel(%arg0: i32, %arg1: memref<8x128xf32, #tpu.memory_space<vmem>>, %arg2: memref<128x384xf32, #tpu.memory_space<vmem>>, %arg3: memref<384x128xbf16, #tpu.memory_space<vmem>>, %arg4: memref<1x128xf32, #tpu.memory_space<vmem>>, %arg5: memref<128x128xbf16, #tpu.memory_space<vmem>>, %arg6: memref<1x128xf32, #tpu.memory_space<vmem>>, %arg7: memref<8x128xf32, #tpu.memory_space<vmem>>, %arg8: memref<8x384xf32, #tpu.memory_space<vmem>>) attributes {dimension_semantics = [#tpu.dimension_semantics<arbitrary>], iteration_bounds = array<i64: 1>, scalar_prefetch = 0 : i64, scratch_operands = 1 : i64, tpu.core_type = #tpu.core_type<tc>, window_params = [{transform_indices = @transform_0, window_bounds = array<i64: 8, 128>}, {transform_indices = @transform_1, window_bounds = array<i64: 128, 384>}, {pipeline_mode = #tpu.pipeline_mode<synchronous>, transform_indices = @transform_2, window_bounds = array<i64: 384, 128>}, {pipeline_mode = #tpu.pipeline_mode<synchronous>, transform_indices = @transform_3, window_bounds = array<i64: 1, 128>}, {pipeline_mode = #tpu.pipeline_mode<synchronous>, transform_indices = @transform_4, window_bounds = array<i64: 128, 128>}, {pipeline_mode = #tpu.pipeline_mode<synchronous>, transform_indices = @transform_5, window_bounds = array<i64: 1, 128>}, {pipeline_mode = #tpu.pipeline_mode<synchronous>, transform_indices = @transform_6, window_bounds = array<i64: 8, 128>}]} {
    %c0_i32 = arith.constant 0 : i32
    %0 = arith.cmpi eq, %arg0, %c0_i32 : i32
    %1 = arith.extui %0 : i1 to i32
    %c0_i32_0 = arith.constant 0 : i32
    %2 = arith.cmpi ne, %1, %c0_i32_0 : i32
    scf.if %2 {
      %cst_10 = arith.constant 0.000000e+00 : f32
      %12 = vector.broadcast %cst_10 : f32 to vector<8x384xf32>
      %c0_11 = arith.constant 0 : index
      %c0_12 = arith.constant 0 : index
      %13 = vector.load %arg8[%c0_11, %c0_12] : memref<8x384xf32, #tpu.memory_space<vmem>>, vector<8x384xf32>
      tpu.vector_store %arg8[%c0_11, %c0_12], %12 {strides = array<i32>} : memref<8x384xf32, #tpu.memory_space<vmem>>, vector<8x384xf32>,
    } else {
    }
    %c0 = arith.constant 0 : index
    %c0_1 = arith.constant 0 : index
    %3 = vector.load %arg8[%c0, %c0_1] : memref<8x384xf32, #tpu.memory_space<vmem>>, vector<8x384xf32>
    %c0_2 = arith.constant 0 : index
    %c0_3 = arith.constant 0 : index
    %4 = vector.load %arg1[%c0_2, %c0_3] : memref<8x128xf32, #tpu.memory_space<vmem>>, vector<8x128xf32>
    %c0_4 = arith.constant 0 : index
    %c0_5 = arith.constant 0 : index
    %5 = vector.load %arg2[%c0_4, %c0_5] : memref<128x384xf32, #tpu.memory_space<vmem>>, vector<128x384xf32>
    %cst = arith.constant dense<0.000000e+00> : vector<8x384xf32>
    %6 = tpu.matmul %4, %5, %cst {dimension_numbers = #tpu.dot_dimension_numbers<[1], [0], [0], [1], [0, 0, 1, 1], [], []>} : vector<8x128xf32>, vector<128x384xf32>, vector<8x384xf32> -> vector<8x384xf32>
    %7 = arith.addf %3, %6 : vector<8x384xf32>
    %c0_6 = arith.constant 0 : index
    %c0_7 = arith.constant 0 : index
    %8 = vector.load %arg8[%c0_6, %c0_7] : memref<8x384xf32, #tpu.memory_space<vmem>>, vector<8x384xf32>
    tpu.vector_store %arg8[%c0_6, %c0_7], %7 {strides = array<i32>} : memref<8x384xf32, #tpu.memory_space<vmem>>, vector<8x384xf32>,
    %c0_i32_8 = arith.constant 0 : i32
    %9 = arith.cmpi eq, %arg0, %c0_i32_8 : i32
    %10 = arith.extui %9 : i1 to i32
    %c0_i32_9 = arith.constant 0 : i32
    %11 = arith.cmpi ne, %10, %c0_i32_9 : i32
    scf.if %11 {
      %c0_10 = arith.constant 0 : index
      %c0_11 = arith.constant 0 : index
      %12 = vector.load %arg8[%c0_10, %c0_11] : memref<8x384xf32, #tpu.memory_space<vmem>>, vector<8x384xf32>
      %13 = arith.truncf %12 : vector<8x384xf32> to vector<8x384xbf16>
      %c0_12 = arith.constant 0 : index
      %c0_13 = arith.constant 0 : index
      %14 = vector.load %arg3[%c0_12, %c0_13] : memref<384x128xbf16, #tpu.memory_space<vmem>>, vector<384x128xbf16>
      %cst_14 = arith.constant dense<0.000000e+00> : vector<8x128xf32>
      %15 = tpu.matmul %13, %14, %cst_14 {dimension_numbers = #tpu.dot_dimension_numbers<[1], [0], [0], [1], [0, 0, 1, 1], [], []>} : vector<8x384xbf16>, vector<384x128xbf16>, vector<8x128xf32> -> vector<8x128xf32>
      %c0_15 = arith.constant 0 : index
      %c0_16 = arith.constant 0 : index
      %16 = vector.load %arg4[%c0_15, %c0_16] : memref<1x128xf32, #tpu.memory_space<vmem>>, vector<1x128xf32>
      %17 = vector.broadcast %16 : vector<1x128xf32> to vector<8x128xf32>
      %18 = arith.addf %15, %17 : vector<8x128xf32>
      %cst_17 = arith.constant 0.000000e+00 : f32
      %19 = vector.broadcast %cst_17 : f32 to vector<8x128xf32>
      %20 = arith.maximumf %18, %19 : vector<8x128xf32>
      %21 = arith.truncf %20 : vector<8x128xf32> to vector<8x128xbf16>
      %c0_18 = arith.constant 0 : index
      %c0_19 = arith.constant 0 : index
      %22 = vector.load %arg5[%c0_18, %c0_19] : memref<128x128xbf16, #tpu.memory_space<vmem>>, vector<128x128xbf16>
      %cst_20 = arith.constant dense<0.000000e+00> : vector<8x128xf32>
      %23 = tpu.matmul %21, %22, %cst_20 {dimension_numbers = #tpu.dot_dimension_numbers<[1], [0], [0], [1], [0, 0, 1, 1], [], []>} : vector<8x128xbf16>, vector<128x128xbf16>, vector<8x128xf32> -> vector<8x128xf32>
      %c0_21 = arith.constant 0 : index
      %c0_22 = arith.constant 0 : index
      %24 = vector.load %arg6[%c0_21, %c0_22] : memref<1x128xf32, #tpu.memory_space<vmem>>, vector<1x128xf32>
      %25 = vector.broadcast %24 : vector<1x128xf32> to vector<8x128xf32>
      %26 = arith.addf %23, %25 : vector<8x128xf32>
      %c0_23 = arith.constant 0 : index
      %c0_24 = arith.constant 0 : index
      %27 = vector.load %arg7[%c0_23, %c0_24] : memref<8x128xf32, #tpu.memory_space<vmem>>, vector<8x128xf32>
      tpu.vector_store %arg7[%c0_23, %c0_24], %26 {strides = array<i32>} : memref<8x128xf32, #tpu.memory_space<vmem>>, vector<8x128xf32>,
    } else {
    }
    return
  }
  func.func @transform_0(%arg0: i32) -> (i32, i32) {
    %c0_i32 = arith.constant 0 : i32
    %c0_i32_0 = arith.constant 0 : i32
    return %c0_i32, %arg0 : i32, i32
  }
  func.func @transform_1(%arg0: i32) -> (i32, i32) {
    %c0_i32 = arith.constant 0 : i32
    %c0_i32_0 = arith.constant 0 : i32
    return %arg0, %c0_i32 : i32, i32
  }
  func.func @transform_2(%arg0: i32) -> (i32, i32) {
    %c0_i32 = arith.constant 0 : i32
    %c0_i32_0 = arith.constant 0 : i32
    %c0_i32_1 = arith.constant 0 : i32
    return %c0_i32, %c0_i32_0 : i32, i32
  }
  func.func @transform_3(%arg0: i32) -> (i32, i32) {
    %c0_i32 = arith.constant 0 : i32
    %c0_i32_0 = arith.constant 0 : i32
    %c0_i32_1 = arith.constant 0 : i32
    return %c0_i32, %c0_i32_0 : i32, i32
  }
  func.func @transform_4(%arg0: i32) -> (i32, i32) {
    %c0_i32 = arith.constant 0 : i32
    %c0_i32_0 = arith.constant 0 : i32
    %c0_i32_1 = arith.constant 0 : i32
    return %c0_i32, %c0_i32_0 : i32, i32
  }
  func.func @transform_5(%arg0: i32) -> (i32, i32) {
    %c0_i32 = arith.constant 0 : i32
    %c0_i32_0 = arith.constant 0 : i32
    %c0_i32_1 = arith.constant 0 : i32
    return %c0_i32, %c0_i32_0 : i32, i32
  }
  func.func @transform_6(%arg0: i32) -> (i32, i32) {
    %c0_i32 = arith.constant 0 : i32
    %c0_i32_0 = arith.constant 0 : i32
    %c0_i32_1 = arith.constant 0 : i32
    return %c0_i32, %c0_i32_0 : i32, i32
  }
}

</mosaic_0001>

<bundles_post_ra>
// kernel: gin_forward.3
= control target key start
LH: loop header
LB: loop body
LE: loop exit
PB: predicated region body
PF: predicated region fallthrough
CT: control target
= control target key end

     0   :  { %v893_v3 = vmov 0.0|0.0   ;;  %v894_v4 = vmov 0.0   ;;  %vm895_vm0 = vmmov 0   ;;  %s1214_s1 = inlined_call_operand.vmem [shape: f32[128,384], index: 1, kind: input, shape index: {}]   ;;  %s1215_s2 = inlined_call_operand.vmem [shape: bf16[384,128], index: 2, kind: input, shape index: {}]   ;;  %s1216_s0 = inlined_call_operand.vmem [shape: f32[8,128], index: 0, kind: input, shape index: {}]   ;;  %s1217_s4 = inlined_call_operand.vmem [shape: bf16[128,128], index: 4, kind: input, shape index: {}]   ;;  %s1218_s3 = inlined_call_operand.vmem [shape: f32[1,128], index: 3, kind: input, shape index: {}]   ;;  %s1219_s5 = inlined_call_operand.vmem [shape: f32[1,128], index: 5, kind: input, shape index: {}]   ;;  %s1220_s6 = inlined_call_operand.vmem [shape: f32[8,128], index: 6, kind: output, shape index: {}]  }
   0x1   :  { %v36_v0 = vld [vmem:[%s1214_s1 + $0x8] sm:$0xff]  ;;  %v39_v1 = vld [vmem:[%s1214_s1 + $0x20] sm:$0xff]  ;;  %834 = vmatprep.subr.bf16.mxu1 %v893_v3  ;;  %147 = vmatprep.mubr.f32.mxu0 %v894_v4  ;;  %v38_v6 = vld [vmem:[%s1214_s1 + $0x18] sm:$0xff] }
   0x2   :  { %v35_v2 = vld [vmem:[%s1214_s1] sm:$0xff]  ;;  %v802_v5 = vpack.c.bf16 %v39_v1, %v36_v0  ;;  %v42_v7 = vld [vmem:[%s1214_s1 + $0x38] sm:$0xff]  ;;  %v45_v8 = vld [vmem:[%s1214_s1 + $0x50] sm:$0xff]  ;;  %759 = vmatprep.mubr.msk.f32.mxu1 %vm895_vm0, %v894_v4 }
   0x3   :  { %v804_v9 = vpack.c.bf16 %v38_v6, %v35_v2  ;;  %v806_v10 = vpack.c.bf16 %v45_v8, %v42_v7  ;;  %v41_v11 = vld [vmem:[%s1214_s1 + $0x30] sm:$0xff]  ;;  %v44_v12 = vld [vmem:[%s1214_s1 + $0x48] sm:$0xff]  ;;  %v51_v16 = vld [vmem:[%s1214_s1 + $0x80] sm:$0xff] }
   0x4   :  { %v37_v13 = vld [vmem:[%s1214_s1 + $0x10] sm:$0xff]  ;;  %803 = vmatprep.subr.bf16.mxu0 %v802_v5  ;;  %v40_v14 = vld [vmem:[%s1214_s1 + $0x28] sm:$0xff]  ;;  %v808_v17 = vpack.c.bf16 %v44_v12, %v41_v11  ;;  %v43_v19 = vld [vmem:[%s1214_s1 + $0x40] sm:$0xff] }
   0x5   :  { %v48_v15 = vld [vmem:[%s1214_s1 + $0x68] sm:$0xff]  ;;  %805 = vmatpush1.bf16.msra.mxu0 %v804_v9  ;;  %v835_v18 = vpack.c.bf16 %v40_v14, %v37_v13  ;;  %v47_v21 = vld [vmem:[%s1214_s1 + $0x60] sm:$0xff]  ;;  %v50_v22 = vld [vmem:[%s1214_s1 + $0x78] sm:$0xff] }
   0x6   :  { %807 = vmatprep.subr.bf16.mxu0 %v806_v10  ;;  %v810_v20 = vpack.c.bf16 %v51_v16, %v48_v15  ;;  %v46_v23 = vld [vmem:[%s1214_s1 + $0x58] sm:$0xff]  ;;  %v57_v26 = vld [vmem:[%s1214_s1 + $0xb0] sm:$0xff]  ;;  %v52_v28 = vld [vmem:[%s1214_s1 + $0x88] sm:$0xff]  ;;  %v812_v29 = vpack.c.bf16 %v50_v22, %v47_v21 }
   0x7   :  { %836 = vmatpush3.bf16.msra.mxu1 %v835_v18  ;;  %v838_v24 = vpack.c.bf16 %v46_v23, %v43_v19  ;;  %v54_v25 = vld [vmem:[%s1214_s1 + $0x98] sm:$0xff]  ;;  %v49_v27 = vld [vmem:[%s1214_s1 + $0x70] sm:$0xff]  ;;  %v56_v32 = vld [vmem:[%s1214_s1 + $0xa8] sm:$0xff] }
   0x8   :  { %837 = vmatprep.subr.bf16.mxu1 %v893_v3  ;;  %v814_v30 = vpack.c.bf16 %v57_v26, %v54_v25  ;;  %v53_v31 = vld [vmem:[%s1214_s1 + $0x90] sm:$0xff]  ;;  %v841_v33 = vpack.c.bf16 %v52_v28, %v49_v27  ;;  %v60_v34 = vld [vmem:[%s1214_s1 + $0xc8] sm:$0xff]  ;;  %v63_v35 = vld [vmem:[%s1214_s1 + $0xe0] sm:$0xff] }
   0x9   :  { %809 = vmatpush1.bf16.msra.mxu0 %v808_v17  ;;  %v55_v36 = vld [vmem:[%s1214_s1 + $0xa0] sm:$0xff]  ;;  %v58_v37 = vld [vmem:[%s1214_s1 + $0xb8] sm:$0xff]  ;;  %v816_v38 = vpack.c.bf16 %v56_v32, %v53_v31  ;;  %v818_v39 = vpack.c.bf16 %v63_v35, %v60_v34  ;;  %v69_v44 = vld [vmem:[%s1214_s1 + $0x110] sm:$0xff] }
   0xa   :  { %811 = vmatprep.subr.bf16.mxu0 %v810_v20  ;;  %v59_v40 = vld [vmem:[%s1214_s1 + $0xc0] sm:$0xff]  ;;  %v62_v41 = vld [vmem:[%s1214_s1 + $0xd8] sm:$0xff]  ;;  %v844_v42 = vpack.c.bf16 %v58_v37, %v55_v36  ;;  %v65_v45 = vld [vmem:[%s1214_s1 + $0xf0] sm:$0xff] }
   0xb   :  { %839 = vmatpush3.bf16.msra.mxu1 %v838_v24  ;;  %v66_v43 = vld [vmem:[%s1214_s1 + $0xf8] sm:$0xff]  ;;  %v68_v46 = vld [vmem:[%s1214_s1 + $0x108] sm:$0xff]  ;;  %v61_v47 = vld [vmem:[%s1214_s1 + $0xd0] sm:$0xff]  ;;  %v820_v49 = vpack.c.bf16 %v62_v41, %v59_v40 }
   0xc   :  { %840 = vmatprep.subr.bf16.mxu1 %v893_v3  ;;  %v64_v48 = vld [vmem:[%s1214_s1 + $0xe8] sm:$0xff]  ;;  %v822_v51 = vpack.c.bf16 %v69_v44, %v66_v43  ;;  %v75_v52 = vld [vmem:[%s1214_s1 + $0x140] sm:$0xff]  ;;  %v74_v56 = vld [vmem:[%s1214_s1 + $0x138] sm:$0xff]  ;;  %v824_v58 = vpack.c.bf16 %v68_v46, %v65_v45 }
   0xd   :  { %813 = vmatpush1.bf16.msra.mxu0 %v812_v29  ;;  %v72_v50 = vld [vmem:[%s1214_s1 + $0x128] sm:$0xff]  ;;  %v847_v53 = vpack.c.bf16 %v64_v48, %v61_v47  ;;  %v67_v54 = vld [vmem:[%s1214_s1 + $0x100] sm:$0xff]  ;;  %v70_v57 = vld [vmem:[%s1214_s1 + $0x118] sm:$0xff] }
   0xe   :  { %815 = vmatprep.subr.bf16.mxu0 %v814_v30  ;;  %v71_v55 = vld [vmem:[%s1214_s1 + $0x120] sm:$0xff]  ;;  %v78_v59 = vld [vmem:[%s1214_s1 + $0x158] sm:$0xff]  ;;  %v826_v60 = vpack.c.bf16 %v75_v52, %v72_v50  ;;  %v81_v61 = vld [vmem:[%s1214_s1 + $0x170] sm:$0xff]  ;;  %v850_v62 = vpack.c.bf16 %v70_v57, %v67_v54 }
   0xf   :  { %842 = vmatpush3.bf16.msra.mxu1 %v841_v33  ;;  %v73_v63 = vld [vmem:[%s1214_s1 + $0x130] sm:$0xff]  ;;  %v76_v0 = vld [vmem:[%s1214_s1 + $0x148] sm:$0xff]  ;;  %v828_v1 = vpack.c.bf16 %v74_v56, %v71_v55  ;;  %v830_v5 = vpack.c.bf16 %v81_v61, %v78_v59  ;;  %v79_v8 = vld [vmem:[%s1214_s1 + $0x160] sm:$0xff] }
  0x10   :  { %843 = vmatprep.subr.bf16.mxu1 %v893_v3  ;;  %v77_v2 = vld [vmem:[%s1214_s1 + $0x150] sm:$0xff]  ;;  %v80_v6 = vld [vmem:[%s1214_s1 + $0x168] sm:$0xff]  ;;  %v853_v7 = vpack.c.bf16 %v76_v0, %v73_v63  ;;  %v82_v9 = vld [vmem:[%s1214_s1 + $0x178] sm:$0xff] }
  0x11   :  { %817 = vmatpush1.bf16.msra.mxu0 %v816_v38  ;;  %v832_v10 = vpack.c.bf16 %v80_v6, %v77_v2  ;;  %v861_v11 = vld [vmem:[%s1215_s2 + $0x40] sm:$0xff]   ;;  %v856_v12 = vpack.c.bf16 %v82_v9, %v79_v8  ;;  %v864_v15 = vld [vmem:[%s1215_s2 + $0x48] sm:$0xff]   ;;  %v867_v18 = vld [vmem:[%s1215_s2 + $0x50] sm:$0xff]  }
  0x12   :  { %819 = vmatprep.subr.bf16.mxu0 %v818_v39  ;;  %v34_v13 = vld [vmem:[%s1216_s0] sm:$0xff]  ;;  %v866_v17 = vld [vmem:[%s1215_s2 + $0x88] sm:$0xff]   ;;  %v868_v19 = vld [vmem:[%s1215_s2 + $0x10] sm:$0xff]  }
  0x13   :  { %845 = vmatpush3.bf16.msra.mxu1 %v844_v42  ;;  %v862_v14 = vld [vmem:[%s1215_s2] sm:$0xff]   ;;  %v870_v20 = vld [vmem:[%s1215_s2 + $0x58] sm:$0xff]   ;;  %v869_v21 = vld [vmem:[%s1215_s2 + $0x90] sm:$0xff]  }
  0x14   :  { %846 = vmatprep.subr.bf16.mxu1 %v893_v3  ;;  %v863_v16 = vld [vmem:[%s1215_s2 + $0x80] sm:$0xff]   ;;  %v871_v22 = vld [vmem:[%s1215_s2 + $0x18] sm:$0xff]   ;;  %v876_v26 = vld [vmem:[%s1215_s2 + $0x68] sm:$0xff]  }
  0x15   :  { %821 = vmatpush1.bf16.msra.mxu0 %v820_v49  ;;  %v873_v23 = vld [vmem:[%s1215_s2 + $0x60] sm:$0xff]   ;;  %v872_v24 = vld [vmem:[%s1215_s2 + $0x98] sm:$0xff]   ;;  %v877_v28 = vld [vmem:[%s1215_s2 + $0x28] sm:$0xff]  }
  0x16   :  { %823 = vmatprep.subr.bf16.mxu0 %v822_v51  ;;  %v874_v25 = vld [vmem:[%s1215_s2 + $0x20] sm:$0xff]   ;;  %v879_v29 = vld [vmem:[%s1215_s2 + $0x70] sm:$0xff]   ;;  %v878_v30 = vld [vmem:[%s1215_s2 + $0xa8] sm:$0xff]  }
  0x17   :  { %848 = vmatpush3.bf16.msra.mxu1 %v847_v53  ;;  %v875_v27 = vld [vmem:[%s1215_s2 + $0xa0] sm:$0xff]   ;;  %v880_v31 = vld [vmem:[%s1215_s2 + $0x30] sm:$0xff]   ;;  %v882_v33 = vld [vmem:[%s1215_s2 + $0x78] sm:$0xff]  }
  0x18   :  { %849 = vmatprep.subr.bf16.mxu1 %v893_v3  ;;  %v881_v32 = vld [vmem:[%s1215_s2 + $0xb0] sm:$0xff]   ;;  %v883_v34 = vld [vmem:[%s1215_s2 + $0x38] sm:$0xff]   ;;  %v885_v40 = vld [vmem:[%s1217_s4] sm:$0xff]  }
  0x19   :  { %825 = vmatpush1.bf16.msra.mxu0 %v824_v58  ;;  %v884_v35 = vld [vmem:[%s1215_s2 + $0xb8] sm:$0xff]   ;;  %v886_v44 = vld [vmem:[%s1217_s4 + $0x8] sm:$0xff]   ;;  %v887_v45 = vld [vmem:[%s1217_s4 + $0x10] sm:$0xff]  }
  0x1a   :  { %827 = vmatprep.subr.bf16.mxu0 %v826_v60  ;;  %v888_v46 = vld [vmem:[%s1217_s4 + $0x18] sm:$0xff]   ;;  %v889_v47 = vld [vmem:[%s1217_s4 + $0x20] sm:$0xff]   ;;  %v890_v48 = vld [vmem:[%s1217_s4 + $0x28] sm:$0xff]  }
  0x1b   :  { %851 = vmatpush3.bf16.msra.mxu1 %v850_v62  ;;  %v891_v49 = vld [vmem:[%s1217_s4 + $0x30] sm:$0xff]   ;;  %v892_v50 = vld [vmem:[%s1217_s4 + $0x38] sm:$0xff]   ;;  %v636_v54 = vld [vmem:[%s1218_s3] ss:$0 sm:$0xff] }
  0x1c   :  { %852 = vmatprep.subr.bf16.mxu1 %v893_v3  ;;  %v661_v0 = vld [vmem:[%s1219_s5] ss:$0 sm:$0xff] }
  0x1d   :  { %829 = vmatpush1.bf16.msra.mxu0 %v828_v1 }
  0x1e   :  { %831 = vmatprep.subr.bf16.mxu0 %v830_v5 }
  0x1f   :  { %854 = vmatpush3.bf16.msra.mxu1 %v853_v7 }
  0x20   :  { %855 = vmatprep.subr.bf16.mxu1 %v893_v3  ;;  %v865_v3 = vld [vmem:[%s1215_s2 + $0x8] sm:$0xff]  }
  0x21   :  { %833 = vmatpush1.bf16.msra.mxu0 %v832_v10 }
  0x22   :  { %687 = vmatprep.subr.bf16.mxu0 %v861_v11 }
  0x23   :  { %857 = vmatpush3.bf16.msra.mxu1 %v856_v12 }
  0x24   :  { %148 = vmatmul.mubr.f32.vlgmr.msra.gmra.mrb[0].mxu0 %v34_v13  ;;  %762 = vmatprep.subr.bf16.mxu1 %v894_v4 }
  0x25   :  { %688 = vmatpush3.bf16.msra.mxu0 %v862_v14 }
  0x26   :  { %760 = vmatmul.mubr.f32.vlgmr.msra.gmra.mrb[0].mxu1 %v34_v13  ;;  %689 = vmatprep.subr.bf16.mxu0 %v864_v15 }
  0x27   :  { %763 = vmatpush3.bf16.msra.mxu1 %v863_v16  ;;  %778 = vmatprep.mubr.msk.bf16.mxu1 %vm895_vm0, %v894_v4 }
  0x28   :  { %764 = vmatprep.subr.bf16.mxu1 %v894_v4 }
  0x29   :  { %690 = vmatpush3.bf16.msra.mxu0 %v865_v3 }
  0x2a   :  { %691 = vmatprep.subr.bf16.mxu0 %v867_v18 }
  0x2b   :  { %765 = vmatpush3.bf16.msra.mxu1 %v866_v17 }
  0x2c   :  { %766 = vmatprep.subr.bf16.mxu1 %v894_v4 }
  0x2d   :  { %692 = vmatpush3.bf16.msra.mxu0 %v868_v19 }
  0x2e   :  { %693 = vmatprep.subr.bf16.mxu0 %v870_v20 }
  0x2f   :  { %767 = vmatpush3.bf16.msra.mxu1 %v869_v21 }
  0x30   :  { %768 = vmatprep.subr.bf16.mxu1 %v894_v4 }
  0x31   :  { %694 = vmatpush3.bf16.msra.mxu0 %v871_v22 }
  0x32   :  { %695 = vmatprep.subr.bf16.mxu0 %v873_v23 }
  0x33   :  { %769 = vmatpush3.bf16.msra.mxu1 %v872_v24 }
  0x34   :  { %770 = vmatprep.subr.bf16.mxu1 %v894_v4 }
  0x35   :  { %696 = vmatpush3.bf16.msra.mxu0 %v874_v25 }
  0x36   :  { %697 = vmatprep.subr.bf16.mxu0 %v876_v26 }
  0x37   :  { %771 = vmatpush3.bf16.msra.mxu1 %v875_v27 }
  0x38   :  { %772 = vmatprep.subr.bf16.mxu1 %v894_v4 }
  0x39   :  { %698 = vmatpush3.bf16.msra.mxu0 %v877_v28 }
  0x3a   :  { %699 = vmatprep.subr.bf16.mxu0 %v879_v29 }
  0x3b   :  { %773 = vmatpush3.bf16.msra.mxu1 %v878_v30 }
  0x3c   :  { %774 = vmatprep.subr.bf16.mxu1 %v894_v4 }
  0x3d   :  { %700 = vmatpush3.bf16.msra.mxu0 %v880_v31 }
  0x3e   :  { %701 = vmatprep.subr.bf16.mxu0 %v882_v33 }
  0x3f   :  { %775 = vmatpush3.bf16.msra.mxu1 %v881_v32 }
  0x40   :  { %776 = vmatprep.subr.bf16.mxu1 %v894_v4 }
  0x41   :  { %702 = vmatpush3.bf16.msra.mxu0 %v883_v34 }
  0x42   :  { %782 = vmatprep.subr.bf16.mxu0 %v894_v4 }
  0x43   :  { %777 = vmatpush3.bf16.msra.mxu1 %v884_v35 }
  0xf7   :  { %v149_v36 = vpop.f32.mrb[0].mxu0 }
  0xf8   :  { %v151_v37 = vpop.f32.mrb[1].mxu0  ;;  %v236_v41 = vpack.c.bf16 %v149_v36, %v149_v36 }
  0xf9   :  { %v237_v38 = vpack.c.bf16 %v151_v37, %v151_v37  ;;  %v220_v39 = vpop.f32.mrb[0].mxu1 }
  0xfa   :  { %v238_v42 = vpack.c.bf16 %v220_v39, %v220_v39  ;;  %v761_v43 = vpop.f32.mrb[1].mxu1 }
  0xfb   :  { %470 = vmatprep.mubr.bf16.mxu0 %v237_v38 }
  0xfc   :  { %471 = vmatmul.mubr.bf16.vlgmr.msra.gmra.mrb[4].mxu0 %v236_v41  ;;  %779 = vmatmul.mubr.bf16.vlgmr.msra.gmra.mrb[4].mxu1 %v238_v42 }
  0xfd   :  { %783 = vmatpush3.bf16.msra.mxu0 %v885_v40  ;;  %798 = vmatprep.mubr.msk.bf16.mxu0 %vm895_vm0, %v894_v4 }
  0xfe   :  { %784 = vmatprep.subr.bf16.mxu0 %v894_v4 }
 0x101   :  { %785 = vmatpush3.bf16.msra.mxu0 %v886_v44 }
 0x102   :  { %786 = vmatprep.subr.bf16.mxu0 %v894_v4 }
 0x105   :  { %787 = vmatpush3.bf16.msra.mxu0 %v887_v45 }
 0x106   :  { %788 = vmatprep.subr.bf16.mxu0 %v894_v4 }
 0x109   :  { %789 = vmatpush3.bf16.msra.mxu0 %v888_v46 }
 0x10a   :  { %790 = vmatprep.subr.bf16.mxu0 %v894_v4 }
 0x10d   :  { %791 = vmatpush3.bf16.msra.mxu0 %v889_v47 }
 0x10e   :  { %792 = vmatprep.subr.bf16.mxu0 %v894_v4 }
 0x111   :  { %793 = vmatpush3.bf16.msra.mxu0 %v890_v48 }
 0x112   :  { %794 = vmatprep.subr.bf16.mxu0 %v894_v4 }
 0x115   :  { %795 = vmatpush3.bf16.msra.mxu0 %v891_v49 }
 0x116   :  { %796 = vmatprep.subr.bf16.mxu0 %v894_v4 }
 0x119   :  { %797 = vmatpush3.bf16.msra.mxu0 %v892_v50 }
 0x1cf   :  { %v703_v51 = vpop.f32.mrb[4].mxu0  ;;  %v512_v52 = vpop.f32.mrb[4].mxu1 }
 0x1d0   :  { %v704_v53 = vpop.f32.mrb[5].mxu0  ;;  %v780_v55 = vpop.f32.mrb[5].mxu1 }
 0x1d1   :  { %v705_v56 = vadd.f32 %v704_v53, %v703_v51  ;;  %v706_v57 = vpop.f32.mrb[6].mxu0  ;;  %v515_v58 = vpop.f32.mrb[6].mxu1 }
 0x1d2   :  { %v707_v59 = vpop.f32.mrb[7].mxu0  ;;  %v781_v60 = vpop.f32.mrb[7].mxu1 }
 0x1d3   :  { %v473_v61 = vadd.f32 %v705_v56, %v636_v54 }
 0x1d5   :  { %v513_v4 = vadd.f32 %v512_v52, %v473_v61 }
 0x1d7   :  { %v518_v62 = vmax.f32 %v513_v4, 0.0 }
 0x1d9   :  { %v519_v63 = vpack.c.bf16 %v518_v62, %v518_v62 }
 0x1db   :  { %799 = vmatmul.mubr.bf16.vlgmr.msra.gmra.mrb[8].mxu0 %v519_v63 }
 0x2ae   :  { %v625_v1 = vpop.f32.mrb[8].mxu0 }
 0x2af   :  { %v626_v2 = vadd.f32 %v661_v0, %v625_v1  ;;  %v800_v5 = vpop.f32.mrb[9].mxu0 }
 0x2b0   :  { %v628_v6 = vpop.f32.mrb[10].mxu0 }
 0x2b1   :  { %631 = vst [vmem:[%s1220_s6] sm:$0xff] %v626_v2  ;;  %v801_v7 = vpop.f32.mrb[11].mxu0 }

// kernel: gin_forward.2
= control target key start
LH: loop header
LB: loop body
LE: loop exit
PB: predicated region body
PF: predicated region fallthrough
CT: control target
= control target key end

     0   :  { %s2726_s0 = inlined_call_operand.vmem [shape: bf16[128,128], index: 0, kind: input, shape index: {}]   ;;  %s2727_s1 = inlined_call_operand.vmem [shape: bf16[128,128], index: 1, kind: input, shape index: {}]   ;;  %s2728_s2 = inlined_call_operand.vmem [shape: bf16[3,128,128], index: 2, kind: input, shape index: {}]   ;;  %s2729_s3 = inlined_call_operand.vmem [shape: f32[3,1,128], index: 3, kind: input, shape index: {}]   ;;  %s2730_s4 = inlined_call_operand.vmem [shape: bf16[3,128,128], index: 4, kind: input, shape index: {}]   ;;  %s2731_s5 = inlined_call_operand.vmem [shape: f32[3,1,128], index: 5, kind: input, shape index: {}]   ;;  %s2732_s6 = inlined_call_operand.vmem [shape: f32[3,1,128], index: 6, kind: input, shape index: {}]   ;;  %s2733_s7 = inlined_call_operand.vmem [shape: f32[3,1,128], index: 7, kind: input, shape index: {}]   ;;  %s2734_s8 = inlined_call_operand.vmem [shape: f32[128,384], index: 8, kind: output, shape index: {}]  }
   0x1   :  { %2737 = sst [smem:[#allocation11_spill]] %s2728_s2 }
   0x2   :  { %s2124_s27 = smov 0   ;;  %s2126_s28 = smov 0  }
   0x3   :  { %s2128_s29 = smov 0   ;;  %s2130_s30 = smov 0  }
   0x4   :  { %s2132_s9 = smov 0  }
   0x5 LB: > { %2738 = sst [smem:[#allocation8_spill]] %s2072_s30  ;;  %s1718_s10 = sadd.s32 4294967295, %s2076_s9   ;;  %s2076_s9 = sphi %s2132_s9, %s18_s9   ;;  %s2072_s30 = sphi %s2130_s30, %s2746_s30   ;;  %s2068_s29 = sphi %s2128_s29, %s2749_s29   ;;  %s2064_s28 = sphi %s2126_s28, %s2748_s28   ;;  %s2060_s27 = sphi %s2124_s27, %s2747_s27  }
   0x6   : > { %s37_s11 = sadd.s32 1, %s2072_s30  ;;  %s223_s12 = sadd.s32 1, %s2064_s28 }
   0x7   : > { %p39_p0 = scmp.ge.s32.totalorder %s37_s11, 3  ;;  %p233_p1 = scmp.ne.s32.totalorder %s2064_s28, %s2060_s27 }
   0x8   : > { %p234_p2 = scmp.eq.s32.totalorder %s1718_s10, 2  ;;  %p1722_p4 = scmp.ge.s32.totalorder %s2076_s9, 1 }
   0x9   : > { %s2751_s11 = smov (%p39_p0, %s37_s11), 0  ;;  %p301_p5 = scmp.lt.s32.totalorder %s2076_s9, 4 }
   0xa   : > { %2739 = sst [smem:[#allocation9_spill]] %s2751_s11  ;;  %p2153_p3 = por %p234_p2, %p233_p1 }
   0xb   : > { %s219_s14 = ssub.s32 %s2072_s30, %s2751_s11  ;;  %p302_p7 = pnand %p1722_p4, %p301_p5 }
   0xc   : > { %p221_p6 = scmp.eq.s32.totalorder %s219_s14, 0  ;;  %s346_s16 = sand.u32 (!%p302_p7), 1, %s2060_s27  }
   0xd   : > { %305 = sbr.rel (%p302_p7) target bundleno = 1092 (0x444), region = 48  ;;  %p349_p8 = scmp.lt.s32.totalorder (!%p302_p7), %s2068_s29, 2 }
   0xe   : > { %s2162_s15 = scalar_select %p221_p6, %s2064_s28, %s223_s12  }
   0xf   : > { %s1723_s17 = sshll.u32 (!%p302_p7), %s346_s16, 7  ;;  %p373_p9 = scmp.eq.s32.totalorder (!%p302_p7), %s2068_s29, 0 }
  0x10   : > { %2741 = sst [smem:[#allocation10_spill]] %s2162_s15  ;;  %s2742_s2 = sld [smem:[#allocation11_spill]] (!%p302_p7) }
  0x11   : > { %s2196_s23 = scalar_lea.vmem (!%p302_p7), [#allocation5], %s1723_s17 }
  0x14   : > { %s2167_s18 = scalar_select %p349_p8, %s2068_s29, 2 }
  0x15   : > { %381 = sbr.rel (!%p373_p9) target bundleno = 31 (0x1f), region = 52  ;;  %v414_v0 = vld [vmem:[%s2726_s0] sm:$0xff] (%p373_p9)  ;;  %v416_v1 = vld [vmem:[%s2726_s0 + $0x8] sm:$0xff] (%p373_p9)  ;;  %v418_v2 = vld [vmem:[%s2726_s0 + $0x10] sm:$0xff] (%p373_p9) }
  0x16   : > { %s1775_s19 = sshll.u32 %s2167_s18, 6  ;;  %s364_s16 = scalar_lea.vmem %s2731_s5, %s2167_s18  ;;  %415 = vst [vmem:[#allocation3] sm:$0xff] (%p373_p9), %v414_v0  ;;  %417 = vst [vmem:[#allocation3 + $0x8] sm:$0xff] (%p373_p9), %v416_v1  ;;  %v420_v3 = vld [vmem:[%s2726_s0 + $0x18] sm:$0xff] (%p373_p9)  ;;  %v422_v4 = vld [vmem:[%s2726_s0 + $0x20] sm:$0xff] (%p373_p9) }
  0x17   : > { %s2177_s25 = scalar_lea.vmem %s2742_s2, %s1775_s19  ;;  %s2182_s10 = scalar_lea.vmem %s2730_s4, %s1775_s19  ;;  %419 = vst [vmem:[#allocation3 + $0x10] sm:$0xff] (%p373_p9), %v418_v2  ;;  %v424_v5 = vld [vmem:[%s2726_s0 + $0x28] sm:$0xff] (%p373_p9)  ;;  %421 = vst [vmem:[#allocation3 + $0x18] sm:$0xff] (%p373_p9), %v420_v3  ;;  %v426_v6 = vld [vmem:[%s2726_s0 + $0x30] sm:$0xff] (%p373_p9) }
  0x18   : > { %s367_s15 = scalar_lea.vmem %s2732_s6, %s2167_s18  ;;  %s370_s22 = scalar_lea.vmem %s2733_s7, %s2167_s18  ;;  %423 = vst [vmem:[#allocation3 + $0x20] sm:$0xff] (%p373_p9), %v422_v4  ;;  %425 = vst [vmem:[#allocation3 + $0x28] sm:$0xff] (%p373_p9), %v424_v5  ;;  %v428_v7 = vld [vmem:[%s2726_s0 + $0x38] sm:$0xff] (%p373_p9) }
  0x19   : > { %427 = vst [vmem:[#allocation3 + $0x30] sm:$0xff] (%p373_p9), %v426_v6  ;;  %429 = vst [vmem:[#allocation3 + $0x38] sm:$0xff] (%p373_p9), %v428_v7 }
  0x1c   : > { %437 = vsyncadd [#allocation4], 1024 }
  0x1d   : > { %2056 = dma.done.wait [#allocation4], 1024 }
  0x1e   : > { %2057 = vsyncadd [#allocation4], 4294966272 }
  0x1f PF: > { %p461_p10 = scmp.lt.s32.totalorder %s2068_s29, 0  ;;  %s462_s27 = ssub.s32 0, %s2068_s29  ;;  %v1980_v8 = vld [vmem:[%s2727_s1] sm:$0xff]   ;;  %v1989_v10 = vld [vmem:[%s2177_s25 + $0x8] sm:$0xff]   ;;  %v1990_v11 = vld [vmem:[%s2177_s25 + $0x10] sm:$0xff]  }
  0x20   : > { %s1730_s12 = smin.u32 %s2068_s29, %s462_s27  ;;  %1843 = vmatprep.mubr.bf16.mxu0 %v1980_v8  ;;  %v1988_v9 = vld [vmem:[%s2177_s25] sm:$0xff]   ;;  %v1991_v15 = vld [vmem:[%s2177_s25 + $0x18] sm:$0xff]   ;;  %v1993_v18 = vld [vmem:[%s2177_s25 + $0x28] sm:$0xff]   ;;  %s2743_s30 = scalar_lea.vmem %s2729_s3, %s2167_s18 }
  0x21   : > { %s464_s17 = sand.u32 1, %s1730_s12   ;;  %1859 = vmatprep.subr.bf16.mxu1 %v1988_v9  ;;  %v1992_v16 = vld [vmem:[%s2177_s25 + $0x20] sm:$0xff]   ;;  %v1981_v23 = vld [vmem:[%s2727_s1 + $0x8] sm:$0xff]   ;;  %v1982_v24 = vld [vmem:[%s2727_s1 + $0x10] sm:$0xff]   ;;  %s1771_s12 = sshll.u32 (%p2153_p3), %s2068_s29, 3 }
  0x22   : > { %s465_s14 = ssub.s32 0, %s464_s17  ;;  %1860 = vmatpush3.bf16.msra.mxu1 %v1988_v9  ;;  %v1983_v25 = vld [vmem:[%s2727_s1 + $0x18] sm:$0xff]   ;;  %v1984_v26 = vld [vmem:[%s2727_s1 + $0x20] sm:$0xff]   ;;  %v1985_v27 = vld [vmem:[%s2727_s1 + $0x28] sm:$0xff]   ;;  %s1490_s11 = scalar_lea.vmem (%p2153_p3), %s2734_s8, %s1771_s12 }
  0x23   : > { %s2753_s14 = smov (!%p461_p10, %s465_s14), %s464_s17  ;;  %1861 = vmatprep.subr.bf16.mxu1 %v1989_v10  ;;  %v1986_v28 = vld [vmem:[%s2727_s1 + $0x30] sm:$0xff]   ;;  %v1987_v29 = vld [vmem:[%s2727_s1 + $0x38] sm:$0xff]   ;;  %v1996_v32 = vld [vmem:[%s2182_s10] sm:$0xff]  }
  0x24   : > { %p1732_p11 = scmp.lt.s32.totalorder %s2753_s14, 0  ;;  %s471_s2 = sadd.s32 2, %s2753_s14  ;;  %v1994_v30 = vld [vmem:[%s2177_s25 + $0x30] sm:$0xff]   ;;  %v1995_v31 = vld [vmem:[%s2177_s25 + $0x38] sm:$0xff]   ;;  %v1997_v33 = vld [vmem:[%s2182_s10 + $0x8] sm:$0xff]  }
  0x25   : > { %v1998_v34 = vld [vmem:[%s2182_s10 + $0x10] sm:$0xff]   ;;  %v2303_v35 = vld [vmem:[%s2182_s10 + $0x18] sm:$0xff]   ;;  %v2307_v36 = vld [vmem:[%s2182_s10 + $0x20] sm:$0xff]  }
  0x26   : > { %s2755_s2 = smov (!%p1732_p11, %s471_s2), %s2753_s14  ;;  %1862 = vmatpush3.bf16.msra.mxu1 %v1989_v10  ;;  %v2312_v37 = vld [vmem:[%s2182_s10 + $0x28] sm:$0xff]  }
  0x27   : > { %s1733_s20 = sshll.u32 %s2755_s2, 7  ;;  %1863 = vmatprep.subr.bf16.mxu1 %v1990_v11 }
  0x28   : > { %s476_s21 = sshra.s32 %s1733_s20, 4 }
  0x29   : > { %s1734_s24 = sshll.u32 %s476_s21, 3 }
  0x2a   : > { %s2231_s19 = scalar_lea.vmem [#allocation3], %s1734_s24  ;;  %1864 = vmatpush3.bf16.msra.mxu1 %v1990_v11 }
  0x2b   : > { %v2234_v12 = vld [vmem:[%s2231_s19] sm:$0xff]  ;;  %v2237_v13 = vld [vmem:[%s2231_s19 + $0x8] sm:$0xff]  ;;  %v2242_v14 = vld [vmem:[%s2231_s19 + $0x10] sm:$0xff]  ;;  %1865 = vmatprep.subr.bf16.mxu1 %v1991_v15 }
  0x2c   : > { %1827 = vmatprep.subr.bf16.mxu0 %v2234_v12  ;;  %v2249_v17 = vld [vmem:[%s2231_s19 + $0x18] sm:$0xff]  ;;  %v2256_v19 = vld [vmem:[%s2231_s19 + $0x20] sm:$0xff]  ;;  %v2261_v20 = vld [vmem:[%s2231_s19 + $0x28] sm:$0xff]  ;;  %v723_v38 = vunpack.c.l.bf16 %v2237_v13  ;;  %v724_v39 = vunpack.c.h.bf16 %v2237_v13  ;;  %v721_v41 = vunpack.c.l.bf16 %v2234_v12  ;;  %v722_v42 = vunpack.c.h.bf16 %v2234_v12 }
  0x2d   : > { %1828 = vmatpush3.bf16.msra.mxu0 %v2234_v12  ;;  %v2266_v21 = vld [vmem:[%s2231_s19 + $0x30] sm:$0xff]  ;;  %v2271_v22 = vld [vmem:[%s2231_s19 + $0x38] sm:$0xff]  ;;  %v727_v51 = vunpack.c.l.bf16 %v2249_v17  ;;  %v728_v53 = vunpack.c.h.bf16 %v2249_v17  ;;  %v725_v55 = vunpack.c.l.bf16 %v2242_v14  ;;  %v726_v56 = vunpack.c.h.bf16 %v2242_v14 }
  0x2e   : > { %1829 = vmatprep.subr.bf16.mxu0 %v2237_v13  ;;  %1866 = vmatpush3.bf16.msra.mxu1 %v1991_v15  ;;  %v731_v1 = vunpack.c.l.bf16 %v2261_v20  ;;  %v732_v3 = vunpack.c.h.bf16 %v2261_v20  ;;  %v729_v5 = vunpack.c.l.bf16 %v2256_v19  ;;  %v730_v6 = vunpack.c.h.bf16 %v2256_v19 }
  0x2f   : > { %1867 = vmatprep.subr.bf16.mxu1 %v1992_v16  ;;  %v735_v15 = vunpack.c.l.bf16 %v2271_v22 }
  0x31   : > { %1830 = vmatpush3.bf16.msra.mxu0 %v2237_v13 }
  0x32   : > { %1831 = vmatprep.subr.bf16.mxu0 %v2242_v14  ;;  %1868 = vmatpush3.bf16.msra.mxu1 %v1992_v16 }
  0x33   : > { %1869 = vmatprep.subr.bf16.mxu1 %v1993_v18 }
  0x35   : > { %1832 = vmatpush3.bf16.msra.mxu0 %v2242_v14 }
  0x36   : > { %1833 = vmatprep.subr.bf16.mxu0 %v2249_v17  ;;  %1870 = vmatpush3.bf16.msra.mxu1 %v1993_v18 }
  0x37   : > { %1871 = vmatprep.subr.bf16.mxu1 %v1994_v30 }
  0x39   : > { %1834 = vmatpush3.bf16.msra.mxu0 %v2249_v17  ;;  %v736_v17 = vunpack.c.h.bf16 %v2271_v22 }
  0x3a   : > { %1835 = vmatprep.subr.bf16.mxu0 %v2256_v19  ;;  %1872 = vmatpush3.bf16.msra.mxu1 %v1994_v30 }
  0x3b   : > { %1873 = vmatprep.subr.bf16.mxu1 %v1995_v31 }
  0x3d   : > { %1836 = vmatpush3.bf16.msra.mxu0 %v2256_v19  ;;  %v733_v19 = vunpack.c.l.bf16 %v2266_v21 }
  0x3e   : > { %1837 = vmatprep.subr.bf16.mxu0 %v2261_v20  ;;  %1874 = vmatpush3.bf16.msra.mxu1 %v1995_v31  ;;  %v2003_v31 = vld [vmem:[%s2182_s10 + $0x38] sm:$0xff]  }
  0x3f   : > { %1923 = vmatprep.subr.bf16.mxu1 %v1996_v32 }
  0x41   : > { %1838 = vmatpush3.bf16.msra.mxu0 %v2261_v20  ;;  %v734_v20 = vunpack.c.h.bf16 %v2266_v21 }
  0x42   : > { %1839 = vmatprep.subr.bf16.mxu0 %v2266_v21 }
  0x45   : > { %1840 = vmatpush3.bf16.msra.mxu0 %v2266_v21  ;;  %v2002_v21 = vld [vmem:[%s2182_s10 + $0x30] sm:$0xff]  }
  0x46   : > { %1841 = vmatprep.subr.bf16.mxu0 %v2271_v22 }
  0x49   : > { %1842 = vmatpush3.bf16.msra.mxu0 %v2271_v22 }
  0x4a   : > { %1891 = vmatprep.subr.bf16.mxu0 %v1996_v32 }
  0x4c   : > { %1844 = vmatmul.mubr.bf16.vlgmr.msra.gmra.mrb[0].mxu0 %v1981_v23 }
  0x4d   : > { %1847 = vmatprep.mubr.bf16.mxu0 %v1982_v24  ;;  %1892 = vmatpush3.bf16.msra.mxu0 %v1996_v32 }
  0x4e   : > { %1893 = vmatprep.subr.bf16.mxu0 %v1997_v33 }
  0x51   : > { %1894 = vmatpush3.bf16.msra.mxu0 %v1997_v33 }
  0x52   : > { %1895 = vmatprep.subr.bf16.mxu0 %v1998_v34 }
  0x54   : > { %1848 = vmatmul.mubr.bf16.gmra.mrb[4].mxu0 %v1983_v25 }
  0x55   : > { %1851 = vmatprep.mubr.bf16.mxu0 %v1984_v26  ;;  %1896 = vmatpush3.bf16.msra.mxu0 %v1998_v34 }
  0x56   : > { %1897 = vmatprep.subr.bf16.mxu0 %v2303_v35 }
  0x59   : > { %1898 = vmatpush3.bf16.msra.mxu0 %v2303_v35 }
  0x5a   : > { %1899 = vmatprep.subr.bf16.mxu0 %v2307_v36 }
  0x5c   : > { %1852 = vmatmul.mubr.bf16.gmra.mrb[8].mxu0 %v1985_v27 }
  0x5d   : > { %1855 = vmatprep.mubr.bf16.mxu0 %v1986_v28  ;;  %1900 = vmatpush3.bf16.msra.mxu0 %v2307_v36 }
  0x5e   : > { %1901 = vmatprep.subr.bf16.mxu0 %v2312_v37 }
  0x61   : > { %1902 = vmatpush3.bf16.msra.mxu0 %v2312_v37 }
  0x62   : > { %1903 = vmatprep.subr.bf16.mxu0 %v2002_v21 }
  0x64   : > { %1856 = vmatmul.mubr.bf16.gmra.mrb[12].mxu0 %v1987_v29 }
  0x65   : > { %1904 = vmatpush3.bf16.msra.mxu0 %v2002_v21 }
  0x66   : > { %1905 = vmatprep.subr.bf16.mxu0 %v2003_v31 }
  0x69   : > { %1906 = vmatpush3.bf16.msra.mxu0 %v2003_v31 }
 0x11f   : > { %v1845_v40 = vpop.f32.mrb[0].mxu0 }
 0x120   : > { %v610_v43 = vpop.f32.mrb[1].mxu0  ;;  %v755_v45 = vadd.f32 %v1845_v40, %v723_v38 }
 0x121   : > { %v1846_v44 = vpop.f32.mrb[2].mxu0  ;;  %v753_v48 = vadd.f32 %v721_v41, %v610_v43 }
 0x122   : > { %v756_v46 = vadd.f32 %v1846_v44, %v724_v39  ;;  %v613_v47 = vpop.f32.mrb[3].mxu0 }
 0x123   : > { %v754_v49 = vadd.f32 %v722_v42, %v613_v47 }
 0x124   : > { %v770_v50 = vpack.c.bf16 %v756_v46, %v755_v45 }
 0x125   : > { %v769_v52 = vpack.c.bf16 %v754_v49, %v753_v48 }
 0x127   : > { %v1849_v54 = vpop.f32.mrb[4].mxu0  ;;  %1875 = vmatprep.mubr.bf16.mxu1 %v769_v52 }
 0x128   : > { %v759_v57 = vadd.f32 %v1849_v54, %v727_v51  ;;  %v626_v58 = vpop.f32.mrb[5].mxu0  ;;  %1876 = vmatmul.mubr.bf16.vlgmr.msra.gmra.mrb[0].mxu1 %v770_v50 }
 0x129   : > { %v1850_v59 = vpop.f32.mrb[6].mxu0  ;;  %1931 = vmatpush3.bf16.msra.mxu1 %v1996_v32  ;;  %v757_v62 = vadd.f32 %v725_v55, %v626_v58  ;;  %v1744_v32 = vld [vmem:[%s2743_s30] ss:$0 sm:$0xff] }
 0x12a   : > { %v760_v60 = vadd.f32 %v1850_v59, %v728_v53  ;;  %v629_v61 = vpop.f32.mrb[7].mxu0  ;;  %1924 = vmatprep.subr.bf16.mxu1 %v1997_v33 }
 0x12b   : > { %v758_v63 = vadd.f32 %v726_v56, %v629_v61 }
 0x12c   : > { %v772_v0 = vpack.c.bf16 %v760_v60, %v759_v57 }
 0x12d   : > { %v771_v2 = vpack.c.bf16 %v758_v63, %v757_v62  ;;  %1932 = vmatpush3.bf16.msra.mxu1 %v1997_v33 }
 0x12e   : > { %1925 = vmatprep.subr.bf16.mxu1 %v1998_v34 }
 0x12f   : > { %v1853_v4 = vpop.f32.mrb[8].mxu0  ;;  %1879 = vmatprep.mubr.bf16.mxu1 %v771_v2 }
 0x130   : > { %v763_v7 = vadd.f32 %v1853_v4, %v731_v1  ;;  %v642_v8 = vpop.f32.mrb[9].mxu0  ;;  %1880 = vmatmul.mubr.bf16.gmra.mrb[4].mxu1 %v772_v0 }
 0x131   : > { %v1854_v9 = vpop.f32.mrb[10].mxu0  ;;  %1933 = vmatpush3.bf16.msra.mxu1 %v1998_v34  ;;  %v761_v12 = vadd.f32 %v729_v5, %v642_v8 }
 0x132   : > { %v764_v10 = vadd.f32 %v1854_v9, %v732_v3  ;;  %v645_v11 = vpop.f32.mrb[11].mxu0  ;;  %1926 = vmatprep.subr.bf16.mxu1 %v2303_v35 }
 0x133   : > { %v762_v13 = vadd.f32 %v730_v6, %v645_v11 }
 0x134   : > { %v774_v14 = vpack.c.bf16 %v764_v10, %v763_v7 }
 0x135   : > { %v773_v16 = vpack.c.bf16 %v762_v13, %v761_v12  ;;  %1934 = vmatpush3.bf16.msra.mxu1 %v2303_v35 }
 0x136   : > { %1927 = vmatprep.subr.bf16.mxu1 %v2307_v36 }
 0x137   : > { %v1857_v18 = vpop.f32.mrb[12].mxu0  ;;  %1883 = vmatprep.mubr.bf16.mxu1 %v773_v16 }
 0x138   : > { %v767_v23 = vadd.f32 %v1857_v18, %v735_v15  ;;  %v658_v24 = vpop.f32.mrb[13].mxu0  ;;  %1884 = vmatmul.mubr.bf16.gmra.mrb[8].mxu1 %v774_v14 }
 0x139   : > { %v1858_v25 = vpop.f32.mrb[14].mxu0  ;;  %1935 = vmatpush3.bf16.msra.mxu1 %v2307_v36  ;;  %v765_v22 = vadd.f32 %v733_v19, %v658_v24 }
 0x13a   : > { %v768_v26 = vadd.f32 %v1858_v25, %v736_v17  ;;  %v661_v27 = vpop.f32.mrb[15].mxu0  ;;  %1928 = vmatprep.subr.bf16.mxu1 %v2312_v37 }
 0x13b   : > { %v766_v28 = vadd.f32 %v734_v20, %v661_v27  ;;  %v1153_v27 = vlaneseq }
 0x13c   : > { %v776_v29 = vpack.c.bf16 %v768_v26, %v767_v23 }
 0x13d   : > { %v775_v30 = vpack.c.bf16 %v766_v28, %v765_v22  ;;  %1936 = vmatpush3.bf16.msra.mxu1 %v2312_v37  ;;  %v1154_v22 = vand.u32 127, %v1153_v27  ;;  %v2351_v28 = vld [vmem:[%s364_s16] ss:$0 sm:$0xff]  ;;  %s1444_s16 = sadd.s32 1, %s2068_s29 }
 0x13e   : > { %1929 = vmatprep.subr.bf16.mxu1 %v2002_v21  ;;  %s1446_s17 = ssub.s32 0, %s1444_s16  ;;  %p1445_p12 = scmp.lt.s32.totalorder %s1444_s16, 0 }
 0x13f   : > { %1887 = vmatprep.mubr.bf16.mxu1 %v775_v30  ;;  %vm1155_vm0 = vcmp.lt.s32.totalorder %v1154_v22, 32  ;;  %s1765_s14 = smin.u32 %s1446_s17, %s1444_s16 }
 0x140   : > { %1888 = vmatmul.mubr.bf16.gmra.mrb[12].mxu1 %v776_v29  ;;  %s1448_s2 = sand.u32 1, %s1765_s14  }
 0x141   : > { %1937 = vmatpush3.bf16.msra.mxu1 %v2002_v21  ;;  %s1449_s20 = ssub.s32 0, %s1448_s2 }
 0x142   : > { %1930 = vmatprep.subr.bf16.mxu1 %v2003_v31  ;;  %s2757_s20 = smov (!%p1445_p12, %s1449_s20), %s1448_s2 }
 0x143   : > { %p1767_p13 = scmp.lt.s32.totalorder %s2757_s20, 0  ;;  %s1455_s21 = sadd.s32 2, %s2757_s20 }
 0x145   : > { %1938 = vmatpush3.bf16.msra.mxu1 %v2003_v31  ;;  %s2759_s21 = smov (!%p1767_p13, %s1455_s21), %s2757_s20 }
 0x146   : > { %s1768_s25 = sshll.u32 %s2759_s21, 7 }
 0x1fb   : > { %v1877_v33 = vpop.f32.mrb[0].mxu1 }
 0x1fc   : > { %v891_v34 = vadd.f32 %v1877_v33, %v1744_v32  ;;  %v882_v35 = vpop.f32.mrb[1].mxu1  ;;  %v2078_v33 = vmov 0.0  }
 0x1fd   : > { %v883_v36 = vadd.f32 %v1744_v32, %v882_v35  ;;  %v1878_v37 = vpop.f32.mrb[2].mxu1 }
 0x1fe   : > { %v894_v38 = vadd.f32 %v1878_v37, %v1744_v32  ;;  %v885_v39 = vpop.f32.mrb[3].mxu1  ;;  %v947_v41 = vmax.f32 %v891_v34, 0.0  ;;  %v2359_v34 = vsel %vm1155_vm0, 1.0, %v2078_v33 }
 0x1ff   : > { %v886_v40 = vadd.f32 %v1744_v32, %v885_v39  ;;  %v945_v43 = vmax.f32 %v883_v36, 0.0 }
 0x200   : > { %v948_v42 = vmax.f32 %v894_v38, 0.0 }
 0x201   : > { %v946_v44 = vmax.f32 %v886_v40, 0.0 }
 0x202   : > { %v962_v45 = vpack.c.bf16 %v948_v42, %v947_v41 }
 0x203   : > { %v961_v46 = vpack.c.bf16 %v946_v44, %v945_v43  ;;  %v1881_v47 = vpop.f32.mrb[4].mxu1 }
 0x204   : > { %v907_v48 = vadd.f32 %v1881_v47, %v1744_v32  ;;  %v898_v49 = vpop.f32.mrb[5].mxu1 }
 0x205   : > { %v899_v50 = vadd.f32 %v1744_v32, %v898_v49  ;;  %v1882_v51 = vpop.f32.mrb[6].mxu1  ;;  %1907 = vmatprep.mubr.bf16.mxu0 %v961_v46 }
 0x206   : > { %v910_v52 = vadd.f32 %v1882_v51, %v1744_v32  ;;  %v901_v53 = vpop.f32.mrb[7].mxu1  ;;  %1908 = vmatmul.mubr.bf16.vlgmr.msra.gmra.mrb[16].mxu0 %v962_v45  ;;  %v951_v55 = vmax.f32 %v907_v48, 0.0 }
 0x207   : > { %v902_v54 = vadd.f32 %v1744_v32, %v901_v53  ;;  %v949_v57 = vmax.f32 %v899_v50, 0.0 }
 0x208   : > { %v952_v56 = vmax.f32 %v910_v52, 0.0 }
 0x209   : > { %v950_v58 = vmax.f32 %v902_v54, 0.0 }
 0x20a   : > { %v964_v59 = vpack.c.bf16 %v952_v56, %v951_v55 }
 0x20b   : > { %v963_v60 = vpack.c.bf16 %v950_v58, %v949_v57  ;;  %v1885_v61 = vpop.f32.mrb[8].mxu1 }
 0x20c   : > { %v923_v62 = vadd.f32 %v1885_v61, %v1744_v32  ;;  %v914_v63 = vpop.f32.mrb[9].mxu1 }
 0x20d   : > { %v915_v0 = vadd.f32 %v1744_v32, %v914_v63  ;;  %v1886_v1 = vpop.f32.mrb[10].mxu1  ;;  %1911 = vmatprep.mubr.bf16.mxu0 %v963_v60 }
 0x20e   : > { %v926_v2 = vadd.f32 %v1886_v1, %v1744_v32  ;;  %v917_v3 = vpop.f32.mrb[11].mxu1  ;;  %1912 = vmatmul.mubr.bf16.gmra.mrb[20].mxu0 %v964_v59  ;;  %v955_v5 = vmax.f32 %v923_v62, 0.0 }
 0x20f   : > { %v918_v4 = vadd.f32 %v1744_v32, %v917_v3  ;;  %v953_v7 = vmax.f32 %v915_v0, 0.0 }
 0x210   : > { %v956_v6 = vmax.f32 %v926_v2, 0.0 }
 0x211   : > { %v954_v8 = vmax.f32 %v918_v4, 0.0 }
 0x212   : > { %v966_v9 = vpack.c.bf16 %v956_v6, %v955_v5 }
 0x213   : > { %v965_v10 = vpack.c.bf16 %v954_v8, %v953_v7  ;;  %v1889_v11 = vpop.f32.mrb[12].mxu1 }
 0x214   : > { %v939_v12 = vadd.f32 %v1889_v11, %v1744_v32  ;;  %v930_v13 = vpop.f32.mrb[13].mxu1 }
 0x215   : > { %v931_v14 = vadd.f32 %v1744_v32, %v930_v13  ;;  %v1890_v15 = vpop.f32.mrb[14].mxu1  ;;  %1915 = vmatprep.mubr.bf16.mxu1 %v965_v10 }
 0x216   : > { %v942_v16 = vadd.f32 %v1890_v15, %v1744_v32  ;;  %v933_v17 = vpop.f32.mrb[15].mxu1  ;;  %1916 = vmatmul.mubr.bf16.vlgmr.msra.gmra.mrb[16].mxu1 %v966_v9  ;;  %v959_v19 = vmax.f32 %v939_v12, 0.0 }
 0x217   : > { %v934_v18 = vadd.f32 %v1744_v32, %v933_v17  ;;  %v957_v23 = vmax.f32 %v931_v14, 0.0 }
 0x218   : > { %v960_v20 = vmax.f32 %v942_v16, 0.0 }
 0x219   : > { %v958_v24 = vmax.f32 %v934_v18, 0.0 }
 0x21a   : > { %v968_v25 = vpack.c.bf16 %v960_v20, %v959_v19 }
 0x21b   : > { %v967_v26 = vpack.c.bf16 %v958_v24, %v957_v23 }
 0x21d   : > { %1919 = vmatprep.mubr.bf16.mxu1 %v967_v26 }
 0x21e   : > { %1920 = vmatmul.mubr.bf16.gmra.mrb[20].mxu1 %v968_v25 }
 0x2d9   : > { %v1909_v29 = vpop.f32.mrb[16].mxu0 }
 0x2da   : > { %v2354_v30 = vadd.f32 %v1909_v29, %v2351_v28  ;;  %v1074_v21 = vpop.f32.mrb[17].mxu0 }
 0x2db   : > { %v2357_v31 = vadd.f32 %v2351_v28, %v1074_v21  ;;  %v1910_v32 = vpop.f32.mrb[18].mxu0 }
 0x2dc   : > { %v1139_v35 = vmax.f32 %v2354_v30, 0.0  ;;  %v2363_v36 = vadd.f32 %v1910_v32, %v2351_v28  ;;  %v1077_v37 = vpop.f32.mrb[19].mxu0 }
 0x2dd   : > { %v1137_v38 = vmax.f32 %v2357_v31, 0.0  ;;  %v2367_v39 = vadd.f32 %v2351_v28, %v1077_v37 }
 0x2de   : > { %v1140_v40 = vmax.f32 %v2363_v36, 0.0  ;;  %v1160_v41 = vmul.f32 %v2359_v34, %v1139_v35 }
 0x2df   : > { %v1138_v42 = vmax.f32 %v2367_v39, 0.0  ;;  %v1158_v43 = vmul.f32 %v2359_v34, %v1137_v38 }
 0x2e0   : > { %1178 = vadd.xlane.f32.xlu1 %v1160_v41  ;;  %v1161_v47 = vmul.f32 %v2359_v34, %v1140_v40 }
 0x2e1   : > { %v1913_v44 = vpop.f32.mrb[20].mxu0  ;;  %1174 = vadd.xlane.f32.xlu0 %v1158_v43  ;;  %v1159_v50 = vmul.f32 %v2359_v34, %v1138_v42 }
 0x2e2   : > { %v2378_v45 = vadd.f32 %v1913_v44, %v2351_v28  ;;  %v1090_v46 = vpop.f32.mrb[21].mxu0 }
 0x2e3   : > { %v2384_v48 = vadd.f32 %v2351_v28, %v1090_v46  ;;  %v1914_v49 = vpop.f32.mrb[22].mxu0 }
 0x2e4   : > { %v1143_v51 = vmax.f32 %v2378_v45, 0.0  ;;  %v2391_v52 = vadd.f32 %v1914_v49, %v2351_v28  ;;  %1180 = vadd.xlane.f32.xlu1 %v1161_v47  ;;  %v1093_v53 = vpop.f32.mrb[23].mxu0 }
 0x2e5   : > { %v2394_v54 = vadd.f32 %v2351_v28, %v1093_v53  ;;  %1176 = vadd.xlane.f32.xlu0 %v1159_v50  ;;  %v1141_v57 = vmax.f32 %v2384_v48, 0.0 }
 0x2e6   : > { %v1144_v55 = vmax.f32 %v2391_v52, 0.0  ;;  %v1164_v56 = vmul.f32 %v2359_v34, %v1143_v51 }
 0x2e7   : > { %v1142_v58 = vmax.f32 %v2394_v54, 0.0  ;;  %v1162_v1 = vmul.f32 %v2359_v34, %v1141_v57 }
 0x2e8   : > { %v1165_v59 = vmul.f32 %v2359_v34, %v1144_v55 }
 0x2e9   : > { %1186 = vadd.xlane.f32.xlu0 %v1164_v56  ;;  %v1917_v60 = vpop.f32.mrb[16].mxu1  ;;  %v1163_v5 = vmul.f32 %v2359_v34, %v1142_v58 }
 0x2ea   : > { %v2406_v61 = vadd.f32 %v1917_v60, %v2351_v28  ;;  %1188 = vadd.xlane.f32.xlu1 %v1165_v59  ;;  %v1106_v62 = vpop.f32.mrb[17].mxu1 }
 0x2eb   : > { %v2409_v63 = vadd.f32 %v2351_v28, %v1106_v62  ;;  %v1918_v0 = vpop.f32.mrb[18].mxu1 }
 0x2ec   : > { %v1147_v2 = vmax.f32 %v2406_v61, 0.0  ;;  %v2416_v3 = vadd.f32 %v1918_v0, %v2351_v28  ;;  %v1109_v4 = vpop.f32.mrb[19].mxu1 }
 0x2ed   : > { %v2422_v6 = vadd.f32 %v2351_v28, %v1109_v4  ;;  %1182 = vadd.xlane.f32.xlu0 %v1162_v1  ;;  %v1145_v9 = vmax.f32 %v2409_v63, 0.0 }
 0x2ee   : > { %v1148_v7 = vmax.f32 %v2416_v3, 0.0  ;;  %1184 = vadd.xlane.f32.xlu1 %v1163_v5  ;;  %v1168_v8 = vmul.f32 %v2359_v34, %v1147_v2 }
 0x2ef   : > { %v1146_v10 = vmax.f32 %v2422_v6, 0.0  ;;  %v1166_v17 = vmul.f32 %v2359_v34, %v1145_v9 }
 0x2f0   : > { %v1169_v11 = vmul.f32 %v2359_v34, %v1148_v7 }
 0x2f1   : > { %1194 = vadd.xlane.f32.xlu0 %v1168_v8  ;;  %v1921_v12 = vpop.f32.mrb[20].mxu1  ;;  %v1167_v19 = vmul.f32 %v2359_v34, %v1146_v10 }
 0x2f2   : > { %1196 = vadd.xlane.f32.xlu1 %v1169_v11  ;;  %v1122_v13 = vpop.f32.mrb[21].mxu1  ;;  %v2434_v14 = vadd.f32 %v1921_v12, %v2351_v28 }
 0x2f3   : > { %v2437_v15 = vadd.f32 %v2351_v28, %v1122_v13  ;;  %v1922_v16 = vpop.f32.mrb[22].mxu1 }
 0x2f4   : > { %v1125_v18 = vpop.f32.mrb[23].mxu1  ;;  %v2447_v23 = vadd.f32 %v1922_v16, %v2351_v28  ;;  %v1151_v25 = vmax.f32 %v2434_v14, 0.0 }
 0x2f5   : > { %v1149_v20 = vmax.f32 %v2437_v15, 0.0  ;;  %v2450_v24 = vadd.f32 %v2351_v28, %v1125_v18  ;;  %1190 = vadd.xlane.f32.xlu0 %v1166_v17 }
 0x2f6   : > { %1192 = vadd.xlane.f32.xlu1 %v1167_v19  ;;  %v1152_v22 = vmax.f32 %v2447_v23, 0.0  ;;  %v1172_v28 = vmul.f32 %v2359_v34, %v1151_v25 }
 0x2f7   : > { %v1150_v26 = vmax.f32 %v2450_v24, 0.0  ;;  %v1170_v27 = vmul.f32 %v2359_v34, %v1149_v20 }
 0x2f8   : > { %v1173_v21 = vmul.f32 %v2359_v34, %v1152_v22 }
 0x2f9   : > { %1198 = vadd.xlane.f32.xlu0 %v1170_v27  ;;  %v1171_v29 = vmul.f32 %v2359_v34, %v1150_v26 }
 0x2fb   : > { %1200 = vadd.xlane.f32.xlu1 %v1171_v29 }
 0x2fd   : > { %1202 = vadd.xlane.f32.xlu0 %v1172_v28 }
 0x2ff   : > { %1204 = vadd.xlane.f32.xlu1 %v1173_v21 }
 0x36d   : > { %v1179_v32 = vpop.xlane.xlu1 %1178 }
 0x36e   : > { %v1208_v33 = vmul.f32 0.03125, %v1179_v32  ;;  %v1175_v37 = vpop.xlane.xlu0 %1174 }
 0x36f   : > { %v1206_v41 = vmul.f32 0.03125, %v1175_v37 }
 0x370   : > { %v1224_v43 = vsub.f32 %v1139_v35, %v1208_v33 }
 0x371   : > { %v1222_v44 = vsub.f32 %v1137_v38, %v1206_v41  ;;  %v1181_v46 = vpop.xlane.xlu1 %1180 }
 0x372   : > { %v1209_v47 = vmul.f32 0.03125, %v1181_v46  ;;  %v1177_v49 = vpop.xlane.xlu0 %1176  ;;  %v2472_v50 = vmul.f32 %v2359_v34, %v1224_v43 }
 0x373   : > { %v1207_v53 = vmul.f32 0.03125, %v1177_v49  ;;  %v2479_v60 = vmul.f32 %v2359_v34, %v1222_v44 }
 0x374   : > { %v1225_v56 = vsub.f32 %v1140_v40, %v1209_v47  ;;  %v1256_v59 = vmul.f32 %v2472_v50, %v2472_v50 }
 0x375   : > { %v1223_v30 = vsub.f32 %v1138_v42, %v1207_v53  ;;  %v1254_v40 = vmul.f32 %v2479_v60, %v2479_v60 }
 0x376   : > { %v1187_v31 = vpop.xlane.xlu0 %1186  ;;  %1274 = vadd.xlane.f32.xlu0 %v1256_v59  ;;  %v2484_v35 = vmul.f32 %v2359_v34, %v1225_v56 }
 0x377   : > { %v1212_v38 = vmul.f32 0.03125, %v1187_v31  ;;  %v1189_v62 = vpop.xlane.xlu1 %1188  ;;  %v2491_v1 = vmul.f32 %v2359_v34, %v1223_v30 }
 0x378   : > { %v1213_v0 = vmul.f32 0.03125, %v1189_v62  ;;  %v1257_v36 = vmul.f32 %v2484_v35, %v2484_v35 }
 0x379   : > { %v1228_v39 = vsub.f32 %v1143_v51, %v1212_v38  ;;  %v1255_v13 = vmul.f32 %v2491_v1, %v2491_v1 }
 0x37a   : > { %v1229_v42 = vsub.f32 %v1144_v55, %v1213_v0  ;;  %v1183_v4 = vpop.xlane.xlu0 %1182  ;;  %1276 = vadd.xlane.f32.xlu1 %v1257_v36  ;;  %1270 = vadd.xlane.f32.xlu0 %v1254_v40 }
 0x37b   : > { %v1210_v5 = vmul.f32 0.03125, %v1183_v4  ;;  %v1185_v8 = vpop.xlane.xlu1 %1184  ;;  %v2498_v11 = vmul.f32 %v2359_v34, %v1228_v39 }
 0x37c   : > { %v1211_v12 = vmul.f32 0.03125, %v1185_v8  ;;  %v2503_v16 = vmul.f32 %v2359_v34, %v1229_v42 }
 0x37d   : > { %v1226_v45 = vsub.f32 %v1141_v57, %v1210_v5  ;;  %v1260_v51 = vmul.f32 %v2498_v11, %v2498_v11 }
 0x37e   : > { %v1227_v52 = vsub.f32 %v1142_v58, %v1211_v12  ;;  %v1195_v55 = vpop.xlane.xlu0 %1194  ;;  %1272 = vadd.xlane.f32.xlu1 %v1255_v13  ;;  %v1261_v29 = vmul.f32 %v2503_v16, %v2503_v16 }
 0x37f   : > { %v1216_v17 = vmul.f32 0.03125, %v1195_v55  ;;  %v1197_v18 = vpop.xlane.xlu1 %1196  ;;  %1282 = vadd.xlane.f32.xlu0 %v1260_v51  ;;  %v2512_v19 = vmul.f32 %v2359_v34, %v1226_v45 }
 0x380   : > { %v1217_v27 = vmul.f32 0.03125, %v1197_v18  ;;  %v2517_v48 = vmul.f32 %v2359_v34, %v1227_v52 }
 0x381   : > { %v1232_v57 = vsub.f32 %v1147_v2, %v1216_v17  ;;  %v1258_v54 = vmul.f32 %v2512_v19, %v2512_v19 }
 0x382   : > { %v1233_v58 = vsub.f32 %v1148_v7, %v1217_v27  ;;  %v1191_v28 = vpop.xlane.xlu0 %1190  ;;  %1284 = vadd.xlane.f32.xlu1 %v1261_v29  ;;  %v1259_v41 = vmul.f32 %v2517_v48, %v2517_v48 }
 0x383   : > { %v1214_v21 = vmul.f32 0.03125, %v1191_v28  ;;  %v1193_v32 = vpop.xlane.xlu1 %1192  ;;  %1278 = vadd.xlane.f32.xlu0 %v1258_v54  ;;  %v2526_v33 = vmul.f32 %v2359_v34, %v1232_v57  ;;  %v2585_v28 = vld [vmem:[%s367_s15] ss:$0 sm:$0xff]  ;;  %s2598_s15 = sshra.s32 %s1768_s25, 4 }
 0x384   : > { %v1215_v37 = vmul.f32 0.03125, %v1193_v32  ;;  %v2531_v61 = vmul.f32 %v2359_v34, %v1233_v58  ;;  %s1769_s18 = sshll.u32 %s2598_s15, 3 }
 0x385   : > { %v1230_v2 = vsub.f32 %v1145_v9, %v1214_v21  ;;  %v1264_v3 = vmul.f32 %v2526_v33, %v2526_v33 }
 0x386   : > { %v1231_v7 = vsub.f32 %v1146_v10, %v1215_v37  ;;  %1280 = vadd.xlane.f32.xlu1 %v1259_v41  ;;  %v1199_v43 = vpop.xlane.xlu0 %1198  ;;  %v1265_v49 = vmul.f32 %v2531_v61, %v2531_v61 }
 0x387   : > { %v1218_v44 = vmul.f32 0.03125, %v1199_v43  ;;  %1290 = vadd.xlane.f32.xlu0 %v1264_v3  ;;  %v2540_v46 = vmul.f32 %v2359_v34, %v1230_v2  ;;  %v2593_v2 = vld [vmem:[%s370_s22] ss:$0 sm:$0xff]  ;;  %s2622_s22 = scalar_lea.vmem [#allocation3], %s1769_s18 }
 0x388   : > { %v1201_v47 = vpop.xlane.xlu1 %1200  ;;  %v2545_v63 = vmul.f32 %v2359_v34, %v1231_v7 }
 0x389   : > { %v1234_v9 = vsub.f32 %v1149_v20, %v1218_v44  ;;  %v1219_v53 = vmul.f32 0.03125, %v1201_v47  ;;  %v1262_v6 = vmul.f32 %v2540_v46, %v2540_v46 }
 0x38a   : > { %1292 = vadd.xlane.f32.xlu1 %v1265_v49  ;;  %v1203_v10 = vpop.xlane.xlu0 %1202  ;;  %v1263_v38 = vmul.f32 %v2545_v63, %v2545_v63 }
 0x38b   : > { %v1235_v56 = vsub.f32 %v1150_v26, %v1219_v53  ;;  %v1220_v59 = vmul.f32 0.03125, %v1203_v10  ;;  %1286 = vadd.xlane.f32.xlu0 %v1262_v6  ;;  %v2554_v30 = vmul.f32 %v2359_v34, %v1234_v9 }
 0x38c   : > { %v1205_v31 = vpop.xlane.xlu1 %1204 }
 0x38d   : > { %v1236_v15 = vsub.f32 %v1151_v25, %v1220_v59  ;;  %v1221_v20 = vmul.f32 0.03125, %v1205_v31  ;;  %v1266_v62 = vmul.f32 %v2554_v30, %v2554_v30  ;;  %v2563_v24 = vmul.f32 %v2359_v34, %v1235_v56 }
 0x38e   : > { %1288 = vadd.xlane.f32.xlu1 %v1263_v38 }
 0x38f   : > { %v1237_v26 = vsub.f32 %v1152_v22, %v1221_v20  ;;  %1294 = vadd.xlane.f32.xlu0 %v1266_v62  ;;  %v1267_v0 = vmul.f32 %v2563_v24, %v2563_v24  ;;  %v2570_v36 = vmul.f32 %v2359_v34, %v1236_v15 }
 0x391   : > { %v1268_v14 = vmul.f32 %v2570_v36, %v2570_v36  ;;  %v2575_v25 = vmul.f32 %v2359_v34, %v1237_v26 }
 0x392   : > { %1296 = vadd.xlane.f32.xlu1 %v1267_v0 }
 0x393   : > { %1298 = vadd.xlane.f32.xlu0 %v1268_v14  ;;  %v1269_v40 = vmul.f32 %v2575_v25, %v2575_v25 }
 0x396   : > { %1300 = vadd.xlane.f32.xlu1 %v1269_v40 }
 0x403   : > { %v1275_v23 = vpop.xlane.xlu0 %1274 }
 0x404   : > { %v1304_v22 = vmul.f32 0.03125, %v1275_v23 }
 0x406   : > { %v1320_v39 = vadd.f32 1e-05, %v1304_v22 }
 0x407   : > { %v1277_v42 = vpop.xlane.xlu1 %1276  ;;  %v1271_v4 = vpop.xlane.xlu0 %1270 }
 0x408   : > { %2004 = vrsqrt.f32 %v1320_v39  ;;  %v1305_v5 = vmul.f32 0.03125, %v1277_v42  ;;  %v1302_v8 = vmul.f32 0.03125, %v1271_v4 }
 0x40a   : > { %v1321_v12 = vadd.f32 1e-05, %v1305_v5  ;;  %v1318_v13 = vadd.f32 1e-05, %v1302_v8 }
 0x40b   : > { %v1273_v45 = vpop.xlane.xlu1 %1272 }
 0x40c   : > { %2006 = vrsqrt.f32 %v1321_v12  ;;  %v1303_v51 = vmul.f32 0.03125, %v1273_v45  ;;  %v1283_v52 = vpop.xlane.xlu0 %1282 }
 0x40d   : > { %2008 = vrsqrt.f32 %v1318_v13  ;;  %v1308_v55 = vmul.f32 0.03125, %v1283_v52 }
 0x40e   : > { %v1319_v17 = vadd.f32 1e-05, %v1303_v51 }
 0x40f   : > { %v1324_v18 = vadd.f32 1e-05, %v1308_v55  ;;  %v1285_v27 = vpop.xlane.xlu1 %1284 }
 0x410   : > { %2010 = vrsqrt.f32 %v1319_v17  ;;  %v1309_v29 = vmul.f32 0.03125, %v1285_v27  ;;  %v1279_v57 = vpop.xlane.xlu0 %1278 }
 0x411   : > { %2012 = vrsqrt.f32 %v1324_v18  ;;  %v1306_v54 = vmul.f32 0.03125, %v1279_v57 }
 0x412   : > { %v2005_v58 = vpop.eup %2004  ;;  %v1325_v21 = vadd.f32 1e-05, %v1309_v29 }
 0x413   : > { %v1352_v32 = vmul.f32 %v2005_v58, %v2472_v50  ;;  %v1322_v37 = vadd.f32 1e-05, %v1306_v54  ;;  %v1281_v41 = vpop.xlane.xlu1 %1280 }
 0x414   : > { %2014 = vrsqrt.f32 %v1325_v21  ;;  %v1307_v3 = vmul.f32 0.03125, %v1281_v41  ;;  %v1291_v7 = vpop.xlane.xlu0 %1290 }
 0x415   : > { %v1375_v43 = vmul.f32 %v2585_v28, %v1352_v32  ;;  %2016 = vrsqrt.f32 %v1322_v37  ;;  %v1312_v44 = vmul.f32 0.03125, %v1291_v7 }
 0x416   : > { %v2007_v47 = vpop.eup %2006  ;;  %v1323_v49 = vadd.f32 1e-05, %v1307_v3 }
 0x417   : > { %v2009_v9 = vpop.eup %2008  ;;  %v1398_v50 = vadd.f32 %v2593_v2, %v1375_v43  ;;  %v1353_v53 = vmul.f32 %v2007_v47, %v2484_v35  ;;  %v1328_v6 = vadd.f32 1e-05, %v1312_v44  ;;  %v1293_v10 = vpop.xlane.xlu1 %1292 }
 0x418   : > { %v1350_v56 = vmul.f32 %v2009_v9, %v2479_v60  ;;  %2018 = vrsqrt.f32 %v1323_v49  ;;  %v1313_v59 = vmul.f32 0.03125, %v1293_v10  ;;  %v1287_v31 = vpop.xlane.xlu0 %1286 }
 0x419   : > { %v1414_v38 = vmul.f32 %v2359_v34, %v1398_v50  ;;  %v1376_v15 = vmul.f32 %v2585_v28, %v1353_v53  ;;  %2020 = vrsqrt.f32 %v1328_v6  ;;  %v1310_v20 = vmul.f32 0.03125, %v1287_v31 }
 0x41a   : > { %v2011_v62 = vpop.eup %2010  ;;  %v1373_v35 = vmul.f32 %v2585_v28, %v1350_v56  ;;  %v1329_v26 = vadd.f32 1e-05, %v1313_v59 }
 0x41b   : > { %v2013_v0 = vpop.eup %2012  ;;  %1430 = vst [vmem:[%s2196_s23 + $0x10] sm:$0xff] %v1414_v38  ;;  %v1399_v14 = vadd.f32 %v2593_v2, %v1376_v15  ;;  %v1351_v60 = vmul.f32 %v2011_v62, %v2491_v1  ;;  %v1326_v40 = vadd.f32 1e-05, %v1310_v20  ;;  %v1289_v23 = vpop.xlane.xlu1 %1288 }
 0x41c   : > { %v1396_v22 = vadd.f32 %v2593_v2, %v1373_v35  ;;  %v1356_v39 = vmul.f32 %v2013_v0, %v2498_v11  ;;  %2022 = vrsqrt.f32 %v1329_v26  ;;  %v1311_v42 = vmul.f32 0.03125, %v1289_v23  ;;  %v1295_v4 = vpop.xlane.xlu0 %1294 }
 0x41d   : > { %v1415_v5 = vmul.f32 %v2359_v34, %v1399_v14  ;;  %v1374_v8 = vmul.f32 %v2585_v28, %v1351_v60  ;;  %2024 = vrsqrt.f32 %v1326_v40  ;;  %v1314_v12 = vmul.f32 0.03125, %v1295_v4 }
 0x41e   : > { %v2015_v13 = vpop.eup %2014  ;;  %v1412_v1 = vmul.f32 %v2359_v34, %v1396_v22  ;;  %v1379_v45 = vmul.f32 %v2585_v28, %v1356_v39  ;;  %v1327_v51 = vadd.f32 1e-05, %v1311_v42 }
 0x41f   : > { %v2017_v52 = vpop.eup %2016  ;;  %1431 = vst [vmem:[%s2196_s23 + $0x18] sm:$0xff] %v1415_v5  ;;  %v1460_v11 = vpack.c.bf16 %v1415_v5, %v1414_v38  ;;  %v1397_v55 = vadd.f32 %v2593_v2, %v1374_v8  ;;  %v1357_v17 = vmul.f32 %v2015_v13, %v2503_v16  ;;  %v1330_v18 = vadd.f32 1e-05, %v1314_v12  ;;  %v1297_v27 = vpop.xlane.xlu1 %1296 }
 0x420   : > { %1428 = vst [vmem:[%s2196_s23] sm:$0xff] %v1412_v1  ;;  %v1402_v29 = vadd.f32 %v2593_v2, %v1379_v45  ;;  %v1354_v57 = vmul.f32 %v2017_v52, %v2512_v19  ;;  %2026 = vrsqrt.f32 %v1327_v51  ;;  %v1315_v54 = vmul.f32 0.03125, %v1297_v27  ;;  %v1299_v58 = vpop.xlane.xlu0 %1298 }
 0x421   : > { %1472 = vst [vmem:[%s2622_s22 + $0x8] sm:$0xff] %v1460_v11  ;;  %v1413_v21 = vmul.f32 %v2359_v34, %v1397_v55  ;;  %v1380_v16 = vmul.f32 %v2585_v28, %v1357_v17  ;;  %2028 = vrsqrt.f32 %v1330_v18  ;;  %v1316_v32 = vmul.f32 0.03125, %v1299_v58 }
 0x422   : > { %v2019_v37 = vpop.eup %2018  ;;  %v1418_v41 = vmul.f32 %v2359_v34, %v1402_v29  ;;  %v1377_v19 = vmul.f32 %v2585_v28, %v1354_v57  ;;  %v1331_v3 = vadd.f32 1e-05, %v1315_v54 }
 0x423   : > { %v2021_v7 = vpop.eup %2020  ;;  %1429 = vst [vmem:[%s2196_s23 + $0x8] sm:$0xff] %v1413_v21  ;;  %v1459_v43 = vpack.c.bf16 %v1413_v21, %v1412_v1  ;;  %v1403_v44 = vadd.f32 %v2593_v2, %v1380_v16  ;;  %v1355_v47 = vmul.f32 %v2019_v37, %v2517_v48  ;;  %v1332_v49 = vadd.f32 1e-05, %v1316_v32  ;;  %v1301_v9 = vpop.xlane.xlu1 %1300 }
 0x424   : > { %1434 = vst [vmem:[%s2196_s23 + $0x30] sm:$0xff] %v1418_v41  ;;  %v1400_v50 = vadd.f32 %v2593_v2, %v1377_v19  ;;  %v1360_v53 = vmul.f32 %v2021_v7, %v2526_v33  ;;  %2030 = vrsqrt.f32 %v1331_v3  ;;  %v1317_v6 = vmul.f32 0.03125, %v1301_v9 }
 0x425   : > { %1471 = vst [vmem:[%s2622_s22] sm:$0xff] %v1459_v43  ;;  %v1419_v10 = vmul.f32 %v2359_v34, %v1403_v44  ;;  %v1378_v56 = vmul.f32 %v2585_v28, %v1355_v47  ;;  %2032 = vrsqrt.f32 %v1332_v49 }
 0x426   : > { %v2023_v59 = vpop.eup %2022  ;;  %v1416_v48 = vmul.f32 %v2359_v34, %v1400_v50  ;;  %v1383_v31 = vmul.f32 %v2585_v28, %v1360_v53  ;;  %v1333_v38 = vadd.f32 1e-05, %v1317_v6  ;;  %v1554_v19 = vld [vmem:[%s2196_s23 + $0x18] sm:$0xff] (%p2153_p3) }
 0x427   : > { %v2025_v15 = vpop.eup %2024  ;;  %1435 = vst [vmem:[%s2196_s23 + $0x38] sm:$0xff] %v1419_v10  ;;  %v1462_v33 = vpack.c.bf16 %v1419_v10, %v1418_v41  ;;  %v1401_v20 = vadd.f32 %v2593_v2, %v1378_v56  ;;  %v1361_v62 = vmul.f32 %v2023_v59, %v2531_v61  ;;  %1555 = vst [vmem:[%s1490_s11 + $0x48] sm:$0xff] (%p2153_p3), %v1554_v19 }
 0x428   : > { %1432 = vst [vmem:[%s2196_s23 + $0x20] sm:$0xff] %v1416_v48  ;;  %v1406_v35 = vadd.f32 %v2593_v2, %v1383_v31  ;;  %v1358_v26 = vmul.f32 %v2025_v15, %v2540_v46  ;;  %2034 = vrsqrt.f32 %v1333_v38 }
 0x429   : > { %1474 = vst [vmem:[%s2622_s22 + $0x18] sm:$0xff] %v1462_v33  ;;  %v1417_v0 = vmul.f32 %v2359_v34, %v1401_v20  ;;  %v1384_v14 = vmul.f32 %v2585_v28, %v1361_v62 }
 0x42a   : > { %v2027_v60 = vpop.eup %2026  ;;  %v1422_v40 = vmul.f32 %v2359_v34, %v1406_v35  ;;  %v1381_v23 = vmul.f32 %v2585_v28, %v1358_v26 }
 0x42b   : > { %v2029_v61 = vpop.eup %2028  ;;  %1433 = vst [vmem:[%s2196_s23 + $0x28] sm:$0xff] %v1417_v0  ;;  %v1461_v22 = vpack.c.bf16 %v1417_v0, %v1416_v48  ;;  %v1407_v39 = vadd.f32 %v2593_v2, %v1384_v14  ;;  %v1359_v46 = vmul.f32 %v2027_v60, %v2545_v63  ;;  %v1560_v43 = vld [vmem:[%s2196_s23 + $0x30] sm:$0xff] (%p2153_p3) }
 0x42c   : > { %1438 = vst [vmem:[%s2196_s23 + $0x50] sm:$0xff] %v1422_v40  ;;  %v1404_v42 = vadd.f32 %v2593_v2, %v1381_v23  ;;  %v1362_v4 = vmul.f32 %v2029_v61, %v2554_v30  ;;  %1561 = vst [vmem:[%s1490_s11 + $0x90] sm:$0xff] (%p2153_p3), %v1560_v43 }
 0x42d   : > { %1473 = vst [vmem:[%s2622_s22 + $0x10] sm:$0xff] %v1461_v22  ;;  %v1423_v5 = vmul.f32 %v2359_v34, %v1407_v39  ;;  %v1382_v8 = vmul.f32 %v2585_v28, %v1359_v46 }
 0x42e   : > { %v2031_v12 = vpop.eup %2030  ;;  %v1420_v13 = vmul.f32 %v2359_v34, %v1404_v42  ;;  %v1385_v1 = vmul.f32 %v2585_v28, %v1362_v4  ;;  %v1562_v44 = vld [vmem:[%s2196_s23 + $0x38] sm:$0xff] (%p2153_p3) }
 0x42f   : > { %v2033_v45 = vpop.eup %2032  ;;  %1439 = vst [vmem:[%s2196_s23 + $0x58] sm:$0xff] %v1423_v5  ;;  %v1464_v63 = vpack.c.bf16 %v1423_v5, %v1422_v40  ;;  %v1405_v51 = vadd.f32 %v2593_v2, %v1382_v8  ;;  %v1363_v52 = vmul.f32 %v2031_v12, %v2563_v24  ;;  %v1556_v3 = vld [vmem:[%s2196_s23 + $0x20] sm:$0xff] (%p2153_p3)  ;;  %1563 = vst [vmem:[%s1490_s11 + $0xa8] sm:$0xff] (%p2153_p3), %v1562_v44 }
 0x430   : > { %1436 = vst [vmem:[%s2196_s23 + $0x40] sm:$0xff] %v1420_v13  ;;  %v1408_v30 = vadd.f32 %v2593_v2, %v1385_v1  ;;  %v1364_v11 = vmul.f32 %v2033_v45, %v2570_v36  ;;  %1557 = vst [vmem:[%s1490_s11 + $0x60] sm:$0xff] (%p2153_p3), %v1556_v3 }
 0x431   : > { %1476 = vst [vmem:[%s2622_s22 + $0x28] sm:$0xff] %v1464_v63  ;;  %v1421_v55 = vmul.f32 %v2359_v34, %v1405_v51  ;;  %v1386_v17 = vmul.f32 %v2585_v28, %v1363_v52 }
 0x432   : > { %v2035_v18 = vpop.eup %2034  ;;  %v1424_v27 = vmul.f32 %v2359_v34, %v1408_v30  ;;  %v1387_v29 = vmul.f32 %v2585_v28, %v1364_v11  ;;  %v1558_v7 = vld [vmem:[%s2196_s23 + $0x28] sm:$0xff] (%p2153_p3) }
 0x433   : > { %1437 = vst [vmem:[%s2196_s23 + $0x48] sm:$0xff] %v1421_v55  ;;  %v1463_v24 = vpack.c.bf16 %v1421_v55, %v1420_v13  ;;  %v1409_v57 = vadd.f32 %v2593_v2, %v1386_v17  ;;  %v1365_v36 = vmul.f32 %v2035_v18, %v2575_v25  ;;  %1559 = vst [vmem:[%s1490_s11 + $0x78] sm:$0xff] (%p2153_p3), %v1558_v7  ;;  %v1568_v9 = vld [vmem:[%s2196_s23 + $0x50] sm:$0xff] (%p2153_p3) }
 0x434   : > { %1440 = vst [vmem:[%s2196_s23 + $0x60] sm:$0xff] %v1424_v27  ;;  %v1410_v54 = vadd.f32 %v2593_v2, %v1387_v29  ;;  %1569 = vst [vmem:[%s1490_s11 + $0xf0] sm:$0xff] (%p2153_p3), %v1568_v9 }
 0x435   : > { %1475 = vst [vmem:[%s2622_s22 + $0x20] sm:$0xff] %v1463_v24  ;;  %v1425_v58 = vmul.f32 %v2359_v34, %v1409_v57  ;;  %v1388_v21 = vmul.f32 %v2585_v28, %v1365_v36  ;;  %v1548_v28 = vld [vmem:[%s2196_s23] sm:$0xff] (%p2153_p3) }
 0x436   : > { %v1426_v16 = vmul.f32 %v2359_v34, %v1410_v54  ;;  %1549 = vst [vmem:[%s1490_s11] sm:$0xff] (%p2153_p3), %v1548_v28  ;;  %v1570_v50 = vld [vmem:[%s2196_s23 + $0x58] sm:$0xff] (%p2153_p3) }
 0x437   : > { %1441 = vst [vmem:[%s2196_s23 + $0x68] sm:$0xff] %v1425_v58  ;;  %v1465_v32 = vpack.c.bf16 %v1425_v58, %v1424_v27  ;;  %v1411_v37 = vadd.f32 %v2593_v2, %v1388_v21  ;;  %1485 = sbr.rel (!%p2153_p3) target bundleno = 1092 (0x444), region = 98  ;;  %v1550_v2 = vld [vmem:[%s2196_s23 + $0x8] sm:$0xff] (%p2153_p3)  ;;  %v1564_v47 = vld [vmem:[%s2196_s23 + $0x40] sm:$0xff] (%p2153_p3)  ;;  %1571 = vst [vmem:[%s1490_s11 + $0x108] sm:$0xff] (%p2153_p3), %v1570_v50 }
 0x438   : > { %1442 = vst [vmem:[%s2196_s23 + $0x70] sm:$0xff] %v1426_v16  ;;  %1551 = vst [vmem:[%s1490_s11 + $0x18] sm:$0xff] (%p2153_p3), %v1550_v2 }
 0x439   : > { %1477 = vst [vmem:[%s2622_s22 + $0x30] sm:$0xff] %v1465_v32  ;;  %v1427_v41 = vmul.f32 %v2359_v34, %v1411_v37  ;;  %v1552_v34 = vld [vmem:[%s2196_s23 + $0x10] sm:$0xff] (%p2153_p3)  ;;  %1565 = vst [vmem:[%s1490_s11 + $0xc0] sm:$0xff] (%p2153_p3), %v1564_v47 }
 0x43a   : > { %1553 = vst [vmem:[%s1490_s11 + $0x30] sm:$0xff] (%p2153_p3), %v1552_v34  ;;  %v1566_v49 = vld [vmem:[%s2196_s23 + $0x48] sm:$0xff] (%p2153_p3) }
 0x43b   : > { %1443 = vst [vmem:[%s2196_s23 + $0x78] sm:$0xff] %v1427_v41  ;;  %v1466_v25 = vpack.c.bf16 %v1427_v41, %v1426_v16  ;;  %1567 = vst [vmem:[%s1490_s11 + $0xd8] sm:$0xff] (%p2153_p3), %v1566_v49  ;;  %v1572_v53 = vld [vmem:[%s2196_s23 + $0x60] sm:$0xff] (%p2153_p3) }
 0x43c   : > { %1573 = vst [vmem:[%s1490_s11 + $0x120] sm:$0xff] (%p2153_p3), %v1572_v53 }
 0x43d   : > { %1478 = vst [vmem:[%s2622_s22 + $0x38] sm:$0xff] %v1466_v25 }
 0x43e   : > { %v1574_v6 = vld [vmem:[%s2196_s23 + $0x68] sm:$0xff] }
 0x43f   : > { %v1576_v10 = vld [vmem:[%s2196_s23 + $0x70] sm:$0xff]  ;;  %1575 = vst [vmem:[%s1490_s11 + $0x138] sm:$0xff] %v1574_v6 }
 0x440   : > { %1577 = vst [vmem:[%s1490_s11 + $0x150] sm:$0xff] %v1576_v10 }
 0x442   : > { %v1578_v56 = vld [vmem:[%s2196_s23 + $0x78] sm:$0xff] }
 0x443   : > { %1579 = vst [vmem:[%s1490_s11 + $0x168] sm:$0xff] %v1578_v56 }
 0x444 PF: > { %s18_s9 = sadd.s32 1, %s2076_s9   ;;  %s2744_s29 = sld [smem:[#allocation10_spill]] }
 0x445   : > { %p15_p0 = scmp.ge.s32.totalorder %s18_s9, 5   ;;  %s2745_s13 = sld [smem:[#allocation8_spill]] }
 0x446   : > { %s2746_s30 = sld [smem:[#allocation9_spill]]  ;;  %s2747_s27 = smov %s2064_s28 }
 0x447   :  { %17 = sbr.rel (!%p15_p0) target bundleno = 5 (0x5), region = 189 }
 0x44a   : > { %s2748_s28 = smov %s2744_s29 }
 0x44b   : > { %s2749_s29 = smov %s2745_s13 }
 0x44e   :  { %1595 = vsyncmov [#allocation4] }
 0x451   :  { %s1596_s23 = vpop.sfrf %1595 }
 0x452   :  { %p1774_p1 = scmp.ne.s32.totalorder %s1596_s23, 0 }
 0x454   :  { %1600 = shalt.err (%p1774_p1)  }

</bundles_post_ra>
